<compile_context>
chip_gen: v7x
topology: tpu7x:2x2x1
jax: 0.10.0
libtpu: 0.0.40
codegen_flags: <defaults>
</compile_context>

<pallas_src>
import functools

import numpy as np
import jax
import jax.numpy as jnp
from jax import lax
from jax.experimental import pallas as pl
from jax.experimental.pallas import tpu as pltpu

# ---- scenario attribute indices (same as reference) -------------------------
SMM_I, DQ_I, MDR_I, SEV_I, REFUND_SMM_I = 0, 1, 2, 3, 4
AGGMDR_I, AGGMDR_TIMING_I, COMPINTHC_I, SERVICING_FEE_I = 5, 6, 7, 8
RECOVERY_LAG_I, REFUND_PREMIUM_I, RATE_RED_I, DQ_ADV_PRIN_I, DQ_ADV_INT_I = 9, 10, 11, 12, 13
L_WAC_I, L_WAM_I, L_PV_I = 0, 1, 2

FEATURE_NAMES = ['Months', 'Prin', 'SchedPrin', 'Prepay Prin', 'Refund Prin',
                 'Default', 'Writedown', 'Recovery', 'Interest', 'Servicing Fee',
                 'Beginning Balance', 'Balance', 'CFL', 'Total Default']
NUM_F = len(FEATURE_NAMES)


class LoanAmortConfig:
    def __init__(self, mode='matched', servicing_fee_method='avg',
                 rate_red_method=False, is_advance=False):
        self.mode = mode
        self.servicing_fee_method = servicing_fee_method
        self.rate_red_method = rate_red_method
        self.is_advance = is_advance


# ------------------------------- kernel --------------------------------------
def _loan_cf_kernel(T, LAG, W, lag_vals, is_advance, servicing_fee_method,
                    scal_ref, curves_ref, out_ref, cpad_ref):
    R = scal_ref.shape[0]
    f32 = jnp.float32
    TL = T + LAG

    lane_i = lax.broadcasted_iota(jnp.int32, (R, W), 1)
    lane_f = lane_i.astype(f32)
    in_T = lane_i < T

    def shift_hi(x, s, fill):
        # out[:, j] = x[:, j - s] for j >= s, else `fill`   (static s >= 1)
        return jnp.where(lane_i >= s, pltpu.roll(x, s, 1), fill)

    def cumsum_lane(x, n):              # inclusive scan, correct for lanes < n
        s = 1
        while s < n:
            x = x + shift_hi(x, s, 0.0)
            s *= 2
        return x

    def cumprod_lane(x, n):
        s = 1
        while s < n:
            x = x * shift_hi(x, s, 1.0)
            s *= 2
        return x

    # ---- stage the T-wide curves into a lane-dense W-wide VMEM buffer -------
    # (tail zeroed every step: scratch is per-core, so no program_id==0 init)
    if W > T:
        cpad_ref[...] = jnp.zeros_like(cpad_ref)
    for k in range(9):
        cpad_ref[k, :, :T] = curves_ref[k]

    smmV = cpad_ref[0]
    dqV = cpad_ref[1]
    mdrV = cpad_ref[2]
    sev0 = cpad_ref[3]                 # zero beyond T
    refund_smm = cpad_ref[4]
    timingV = cpad_ref[5]
    rate_redV = cpad_ref[6]
    dq_adv_prin = cpad_ref[7]
    dq_adv_int = cpad_ref[8]

    scal = scal_ref[...]
    wac = scal[:, 0:1]
    wamV = scal[:, 1:2]
    pv = scal[:, 2:3]
    aggMDR = scal[:, 3:4]
    compIntHC = scal[:, 4:5]
    servicing_fee = scal[:, 5:6]
    recovery_lag = scal[:, 6:7]

    # --- fixed-payment amortization (rate_red_method == False) ---------------
    rateV = (wac - rate_redV) / 12.0
    # TODO(synk): use jnp.log1p once verified in Mosaic for a few extra ulps.
    lg = jnp.log(1.0 + rateV)                          # 1 log + 2 exp per elem
    inv_annuity = 1.0 - jnp.exp(-wamV * lg)
    X = pv * rateV / inv_annuity
    g_pow = jnp.exp((lane_f - wamV) * lg)
    bal = jnp.where(lane_f <= wamV, pv * (1.0 - g_pow) / inv_annuity, 0.0)
    # balance at period lane+1 (strict mask: bal(wam) == 0 exactly, no lane T needed)
    bal_next = jnp.where(lane_f + 1.0 < wamV, pltpu.roll(bal, W - 1, 1), 0.0)
    interestsV = bal * rateV
    principalsV = jnp.where(in_T, X - interestsV, 0.0)
    # guarded division (reference would produce NaN/inf for rows with wam < T)
    paydownV = jnp.where(bal > 0.0, principalsV / bal, 0.0)

    # --- survivorship ---------------------------------------------------------
    p_survV = cumprod_lane(1.0 - smmV - refund_smm - mdrV, T)
    default_aggMDRV = pv * aggMDR * timingV
    dqPrin_aggMDRV = paydownV * default_aggMDRV
    scaled = default_aggMDRV / (bal * p_survV + 1e-12)   # same epsilon as reference
    cum_scaled = cumsum_lane(scaled, T)
    surv_next = p_survV * (1.0 - cum_scaled)             # survivorship at lane+1
    survivorship = shift_hi(surv_next, 1, 1.0)           # survivorship at lane

    b_balanceV = survivorship * bal
    actualBalanceV = surv_next * bal_next

    surv_prin = survivorship * principalsV
    schedDQPrinV = surv_prin * (1.0 - mdrV) * dqV * (1.0 - dq_adv_prin)
    schedDefaultPrinV = surv_prin * mdrV + dqPrin_aggMDRV
    schedPrinV = surv_prin - schedDQPrinV - schedDefaultPrinV
    prepayPrinV = survivorship * bal_next * smmV
    defaultV = b_balanceV * mdrV + default_aggMDRV
    writedownV = defaultV

    # per-row recovery-lag right shift, unrolled over DISTINCT lags only
    if len(lag_vals) == 1:
        d = lag_vals[0]
        wd_shift = writedownV if d == 0 else shift_hi(writedownV, d, 0.0)
    else:
        wd_shift = jnp.zeros_like(writedownV)
        for d in lag_vals:
            shifted = writedownV if d == 0 else shift_hi(writedownV, d, 0.0)
            wd_shift = wd_shift + jnp.where(recovery_lag == float(d), shifted, 0.0)

    # pad_zeros(sevV, ..., 'last'); the zero-beyond-(T+lag) part multiplies a
    # zero writedown anyway, so only the 'last'-extension is needed.
    sev_ext = jnp.where(in_T, sev0, sev0[:, T - 1:T])
    recoveryV = wd_shift * (1.0 - sev_ext)

    refundPrinV = survivorship * bal_next * refund_smm
    totalPrinV = schedPrinV + prepayPrinV + recoveryV
    compIntV = prepayPrinV * rateV * compIntHC
    refundIntV = refundPrinV * rateV

    defaultBalV = jnp.maximum(cumsum_lane(defaultV - wd_shift, TL), 0.0)
    b_totalBalV = b_balanceV + shift_hi(defaultBalV, 1, 0.0)
    totalBalV = actualBalanceV + defaultBalV

    sfee_rate = servicing_fee * (1.0 / 12.0)
    if servicing_fee_method == 'avg':
        servicingFeeV = (b_totalBalV + totalBalV) * 0.5 * sfee_rate
    else:
        servicingFeeV = b_totalBalV * sfee_rate

    if is_advance:
        actInterestV = rateV * b_balanceV
    else:
        actInterestV = (rateV * (b_balanceV * (1.0 - (1.0 - mdrV) * dqV *
                                               (1.0 - dq_adv_int) - mdrV)
                                 - default_aggMDRV) - compIntV)
    actInterestV = actInterestV - refundIntV
    cfV = totalPrinV + actInterestV
    totalDefaultV = schedDQPrinV + schedDefaultPrinV + defaultV

    # single lane-dense consolidated output block (dense full-vreg stores)
    out_ref[0] = lane_f + 1.0          # Months
    out_ref[1] = totalPrinV            # Prin
    out_ref[2] = schedPrinV            # SchedPrin
    out_ref[3] = prepayPrinV           # Prepay Prin
    out_ref[4] = refundPrinV           # Refund Prin
    out_ref[5] = defaultV              # Default
    out_ref[6] = wd_shift              # Writedown
    out_ref[7] = recoveryV             # Recovery
    out_ref[8] = actInterestV          # Interest
    out_ref[9] = servicingFeeV         # Servicing Fee
    out_ref[10] = b_balanceV           # Beginning Balance
    out_ref[11] = actualBalanceV       # Balance
    out_ref[12] = cfV                  # CFL
    out_ref[13] = totalDefaultV        # Total Default


# ------------------------------ wrapper ---------------------------------------
def _round_up(x, m):
    return (int(x) + m - 1) // m * m


def _vmem_limit_bytes():
    cap = 64 * 1024 * 1024                      # conservative default (v7x)
    try:
        info = pltpu.get_tpu_info()
        cap = int(getattr(info, "vmem_capacity_bytes", cap))
    except Exception:
        pass
    # leave headroom for Mosaic internal scratch / double buffers
    return max(32 * 1024 * 1024, min((cap * 3) // 4, 100 * 1024 * 1024))


def _choose_tile_n(n_rows, T, W, vmem_limit):
    # per-row VMEM: 2x input blocks (scal + 9 T-wide curves), 2x output block,
    # the W-wide staging scratch, and ~80 live W-wide f32 temps (body + scans).
    per_row = 4 * (2 * (9 * T + 8) + 2 * NUM_F * W + 9 * W + 80 * W)
    budget = (2 * vmem_limit) // 3
    t = max(8, (int(budget // per_row) // 8) * 8)
    t = min(t, 1024)
    # guarantee >= 4 grid steps when there is enough work:
    # 2 TensorCores on v7x (parallel axis) x >= 2 steps/core for pipelining.
    t = min(t, max(8, _round_up(-(-n_rows // 4), 8)))
    return max(8, t)


@functools.partial(jax.jit, static_argnames=("n", "tl"))
def _slice_transpose(out, n, tl):
    # TODO(synk): consumers that can accept [F, N, T+lag] directly should skip
    # this (only remaining) epilogue pass.
    return jnp.transpose(out[:, :n, :tl], (1, 2, 0))


def _run_cashflow(config, wac, wam, pv, smmV, dqV, mdrV, sevV, recovery_lag,
                  refund_smm, aggMDR, aggMDR_timingV, compIntHC, servicing_fee,
                  rate_redV, dq_adv_prin, dq_adv_int):
    # TODO(synk): rate_red_method=True (alpha/cumprod schedule) not implemented.
    assert config.rate_red_method is False, "only rate_red_method=False supported"
    f32 = jnp.float32
    N, T = smmV.shape
    assert int(round(float(np.asarray(wam).max()))) == T, "max(wam) must equal periods"

    recovery_lag = jnp.maximum(jnp.trunc(jnp.asarray(recovery_lag, f32)), 0.0)
    lag_np = np.asarray(recovery_lag).astype(np.int64)           # host-side (.item()-like)
    if lag_np.size:
        lag_vals = tuple(sorted({int(v) for v in lag_np.tolist()}))
    else:
        lag_vals = (0,)
    LAG = max(lag_vals)
    TL = T + LAG
    W = _round_up(TL, 128)                                       # lane-dense width

    vmem_limit = _vmem_limit_bytes()
    TILE_N = _choose_tile_n(N, T, W, vmem_limit)
    Npad = _round_up(N, TILE_N)

    # per-row scalars [N, 8]
    scal = jnp.stack([jnp.asarray(wac, f32), jnp.asarray(wam, f32),
                      jnp.asarray(pv, f32), jnp.asarray(aggMDR, f32),
                      jnp.asarray(compIntHC, f32), jnp.asarray(servicing_fee, f32),
                      recovery_lag, jnp.zeros((N,), f32)], axis=1)

    # curves stay UNPADDED: [9, N, T]; the kernel stages them to width W.
    curves = jnp.stack([jnp.asarray(v, f32) for v in
                        (smmV, dqV, mdrV, sevV, refund_smm, aggMDR_timingV,
                         rate_redV, dq_adv_prin, dq_adv_int)], axis=0)

    if Npad != N:
        # filler rows only when N is not tile-aligned; garbage there is sliced off
        scal = jnp.pad(scal, ((0, Npad - N), (0, 0)))
        curves = jnp.pad(curves, ((0, 0), (0, Npad - N), (0, 0)))

    kernel = functools.partial(_loan_cf_kernel, T, LAG, W, lag_vals,
                               config.is_advance, config.servicing_fee_method)

    scan_steps = 2 * int(np.ceil(np.log2(max(T, 2)))) + int(np.ceil(np.log2(max(TL, 2))))
    cost = pl.CostEstimate(
        flops=int(Npad) * W * (110 + 3 * scan_steps),
        transcendentals=3 * int(Npad) * W,
        bytes_accessed=4 * int(Npad) * (9 * T + 8 + NUM_F * W))

    out = pl.pallas_call(
        kernel,
        out_shape=jax.ShapeDtypeStruct((NUM_F, Npad, W), f32),
        grid_spec=pltpu.PrefetchScalarGridSpec(
            num_scalar_prefetch=0,
            grid=(Npad // TILE_N,),
            in_specs=[pl.BlockSpec((TILE_N, 8), lambda i: (i, 0)),
                      pl.BlockSpec((9, TILE_N, T), lambda i: (0, i, 0))],
            out_specs=pl.BlockSpec((NUM_F, TILE_N, W), lambda i: (0, i, 0)),
            scratch_shapes=[pltpu.VMEM((9, TILE_N, W), f32)]),
        compiler_params=pltpu.CompilerParams(
            dimension_semantics=("parallel",),
            vmem_limit_bytes=int(vmem_limit)),
        cost_estimate=cost,
    )(scal, curves)

    # [F, Npad, W] -> [N, T+LAG, F]  (single fused slice+transpose pass)
    return _slice_transpose(out, n=N, tl=TL)


class LoanAmort:
    def __init__(self, loans_tensor):
        """loans_tensor: [n_loans, 3]  (columns: wac, wam, pv)"""
        self.loans_tensor = jnp.asarray(loans_tensor, jnp.float32)
        self.n_loans = int(self.loans_tensor.shape[0])
        self.max_wam = int(np.asarray(loans_tensor)[:, 1].max())

    def forward(self, scenarios_tensor, config):
        scenarios_tensor = jnp.asarray(scenarios_tensor, jnp.float32)
        n_scenarios, n_vectors, max_wam = scenarios_tensor.shape
        loans = self.loans_tensor
        n_loans = self.n_loans

        if config.mode == 'matched':
            assert n_loans == n_scenarios
            wac, wam, pv = loans[:, L_WAC_I], loans[:, L_WAM_I], loans[:, L_PV_I]
            vec = lambda i: scenarios_tensor[:, i, :]
            sc0 = lambda i: scenarios_tensor[:, i, 0]
        else:
            # TODO(synk): exhaustive mode still materializes all (loan, scenario)
            # pairs; a 2-D (loan_tile, scenario_tile) grid reading the original
            # arrays would cut input HBM traffic by ~n_loans x.
            rep = lambda x: jnp.repeat(x, n_scenarios)
            wac, wam, pv = rep(loans[:, L_WAC_I]), rep(loans[:, L_WAM_I]), rep(loans[:, L_PV_I])
            vec = lambda i: jnp.tile(scenarios_tensor[:, i, :], (n_loans, 1))
            sc0 = lambda i: jnp.tile(scenarios_tensor[:, i, 0], (n_loans,))

        result = _run_cashflow(
            config, wac, wam, pv,
            vec(SMM_I), vec(DQ_I), vec(MDR_I), vec(SEV_I),
            sc0(RECOVERY_LAG_I), vec(REFUND_SMM_I), sc0(AGGMDR_I),
            vec(AGGMDR_TIMING_I), sc0(COMPINTHC_I), sc0(SERVICING_FEE_I),
            vec(RATE_RED_I), vec(DQ_ADV_PRIN_I), vec(DQ_ADV_INT_I))

        if config.mode == 'matched':
            return result, FEATURE_NAMES
        period_with_lag = result.shape[1]
        return (result.reshape(n_loans, n_scenarios, period_with_lag, NUM_F),
                FEATURE_NAMES)


# ------------------------------- demo -----------------------------------------
if __name__ == "__main__":
    key = jax.random.PRNGKey(0)
    k = jax.random.split(key, 8)
    n = 8     # n_loans == n_scenarios (matched mode)
    T = 16    # max_wam / number of periods

    wac = jax.random.uniform(k[0], (n,), minval=0.03, maxval=0.09)
    wam = jnp.full((n,), float(T))
    pv = jax.random.uniform(k[1], (n,), minval=5e4, maxval=2e5)
    loans = jnp.stack([wac, wam, pv], axis=1).astype(jnp.float32)

    scen = jnp.zeros((n, 14, T), jnp.float32)
    scen = scen.at[:, SMM_I, :].set(jax.random.uniform(k[2], (n, T), minval=0.002, maxval=0.02))
    scen = scen.at[:, DQ_I, :].set(jax.random.uniform(k[3], (n, T), minval=0.0, maxval=0.03))
    scen = scen.at[:, MDR_I, :].set(jax.random.uniform(k[4], (n, T), minval=0.0, maxval=0.008))
    scen = scen.at[:, SEV_I, :].set(jax.random.uniform(k[5], (n, T), minval=0.3, maxval=0.6))
    scen = scen.at[:, REFUND_SMM_I, :].set(0.001)
    scen = scen.at[:, AGGMDR_I, :].set(0.02)
    scen = scen.at[:, AGGMDR_TIMING_I, :].set(1.0 / T)
    scen = scen.at[:, COMPINTHC_I, :].set(0.5)
    scen = scen.at[:, SERVICING_FEE_I, :].set(0.01)
    lags = jnp.asarray(np.arange(n) % 3, jnp.float32)          # recovery lags 0..2
    scen = scen.at[:, RECOVERY_LAG_I, :].set(lags[:, None])
    scen = scen.at[:, REFUND_PREMIUM_I, :].set(0.0)
    scen = scen.at[:, RATE_RED_I, :].set(0.0)
    scen = scen.at[:, DQ_ADV_PRIN_I, :].set(0.5)
    scen = scen.at[:, DQ_ADV_INT_I, :].set(0.5)

    cfg = LoanAmortConfig(mode='matched', servicing_fee_method='avg',
                          rate_red_method=False, is_advance=False)
    model = LoanAmort(loans)
    result, names = model.forward(scen, cfg)
    jax.block_until_ready(result)

    TL = T + 2  # max recovery lag in the demo is 2
    assert result.shape == (n, TL, len(names)), result.shape
    assert bool(jnp.isfinite(result).all())
    # cheap invariants: Months = 1..TL, Beginning Balance at month 1 == pv
    months = jnp.arange(1, TL + 1, dtype=jnp.float32)
    assert bool(jnp.allclose(result[:, :, 0], months[None, :]))
    bb_idx = FEATURE_NAMES.index('Beginning Balance')
    assert bool(jnp.allclose(result[:, 0, bb_idx], pv, rtol=1e-4))
    print("KERNEL_OK")
</pallas_src>

<mosaic_0001>
module attributes {stable_mosaic.version = 11 : i64} {
  func.func @_loan_cf_kernel(%arg0: i32, %arg1: memref<8x8xf32, #tpu.memory_space<vmem>>, %arg2: memref<9x8x16xf32, #tpu.memory_space<vmem>>, %arg3: memref<14x8x128xf32, #tpu.memory_space<vmem>>, %arg4: memref<9x8x128xf32, #tpu.memory_space<vmem>>) attributes {dimension_semantics = [#tpu.dimension_semantics<parallel>], iteration_bounds = array<i64: 1>, scalar_prefetch = 0 : i64, scratch_operands = 1 : i64, tpu.core_type = #tpu.core_type<tc>, window_params = [{transform_indices = @transform_0, window_bounds = array<i64: 8, 8>}, {transform_indices = @transform_1, window_bounds = array<i64: 9, 8, 16>}, {transform_indices = @transform_2, window_bounds = array<i64: 14, 8, 128>}]} {
    %0 = tpu.iota {dimensions = array<i32: 1>} : vector<8x128xi32>
    %1 = arith.sitofp %0 : vector<8x128xi32> to vector<8x128xf32>
    %c16_i32 = arith.constant 16 : i32
    %2 = vector.broadcast %c16_i32 : i32 to vector<8x128xi32>
    %3 = arith.cmpi slt, %0, %2 : vector<8x128xi32>
    %cst = arith.constant 0.000000e+00 : f32
    %4 = vector.broadcast %cst : f32 to vector<9x8x128xf32>
    %c0 = arith.constant 0 : index
    %c0_0 = arith.constant 0 : index
    %c0_1 = arith.constant 0 : index
    %5 = vector.load %arg4[%c0, %c0_0, %c0_1] : memref<9x8x128xf32, #tpu.memory_space<vmem>>, vector<9x8x128xf32>
    tpu.vector_store %arg4[%c0, %c0_0, %c0_1], %4 {strides = array<i32>} : memref<9x8x128xf32, #tpu.memory_space<vmem>>, vector<9x8x128xf32>,
    %c0_2 = arith.constant 0 : index
    %c0_3 = arith.constant 0 : index
    %c0_4 = arith.constant 0 : index
    %6 = vector.load %arg2[%c0_2, %c0_3, %c0_4] : memref<9x8x16xf32, #tpu.memory_space<vmem>>, vector<1x8x16xf32>
    %7 = vector.shape_cast %6 : vector<1x8x16xf32> to vector<8x16xf32>
    %c0_5 = arith.constant 0 : index
    %c0_6 = arith.constant 0 : index
    %c0_7 = arith.constant 0 : index
    %8 = vector.load %arg4[%c0_5, %c0_6, %c0_7] : memref<9x8x128xf32, #tpu.memory_space<vmem>>, vector<1x8x16xf32>
    %9 = vector.shape_cast %8 : vector<1x8x16xf32> to vector<8x16xf32>
    %10 = vector.shape_cast %7 : vector<8x16xf32> to vector<1x8x16xf32>
    tpu.vector_store %arg4[%c0_5, %c0_6, %c0_7], %10 {strides = array<i32>} : memref<9x8x128xf32, #tpu.memory_space<vmem>>, vector<1x8x16xf32>,
    %c1 = arith.constant 1 : index
    %c0_8 = arith.constant 0 : index
    %c0_9 = arith.constant 0 : index
    %11 = vector.load %arg2[%c1, %c0_8, %c0_9] : memref<9x8x16xf32, #tpu.memory_space<vmem>>, vector<1x8x16xf32>
    %12 = vector.shape_cast %11 : vector<1x8x16xf32> to vector<8x16xf32>
    %c1_10 = arith.constant 1 : index
    %c0_11 = arith.constant 0 : index
    %c0_12 = arith.constant 0 : index
    %13 = vector.load %arg4[%c1_10, %c0_11, %c0_12] : memref<9x8x128xf32, #tpu.memory_space<vmem>>, vector<1x8x16xf32>
    %14 = vector.shape_cast %13 : vector<1x8x16xf32> to vector<8x16xf32>
    %15 = vector.shape_cast %12 : vector<8x16xf32> to vector<1x8x16xf32>
    tpu.vector_store %arg4[%c1_10, %c0_11, %c0_12], %15 {strides = array<i32>} : memref<9x8x128xf32, #tpu.memory_space<vmem>>, vector<1x8x16xf32>,
    %c2 = arith.constant 2 : index
    %c0_13 = arith.constant 0 : index
    %c0_14 = arith.constant 0 : index
    %16 = vector.load %arg2[%c2, %c0_13, %c0_14] : memref<9x8x16xf32, #tpu.memory_space<vmem>>, vector<1x8x16xf32>
    %17 = vector.shape_cast %16 : vector<1x8x16xf32> to vector<8x16xf32>
    %c2_15 = arith.constant 2 : index
    %c0_16 = arith.constant 0 : index
    %c0_17 = arith.constant 0 : index
    %18 = vector.load %arg4[%c2_15, %c0_16, %c0_17] : memref<9x8x128xf32, #tpu.memory_space<vmem>>, vector<1x8x16xf32>
    %19 = vector.shape_cast %18 : vector<1x8x16xf32> to vector<8x16xf32>
    %20 = vector.shape_cast %17 : vector<8x16xf32> to vector<1x8x16xf32>
    tpu.vector_store %arg4[%c2_15, %c0_16, %c0_17], %20 {strides = array<i32>} : memref<9x8x128xf32, #tpu.memory_space<vmem>>, vector<1x8x16xf32>,
    %c3 = arith.constant 3 : index
    %c0_18 = arith.constant 0 : index
    %c0_19 = arith.constant 0 : index
    %21 = vector.load %arg2[%c3, %c0_18, %c0_19] : memref<9x8x16xf32, #tpu.memory_space<vmem>>, vector<1x8x16xf32>
    %22 = vector.shape_cast %21 : vector<1x8x16xf32> to vector<8x16xf32>
    %c3_20 = arith.constant 3 : index
    %c0_21 = arith.constant 0 : index
    %c0_22 = arith.constant 0 : index
    %23 = vector.load %arg4[%c3_20, %c0_21, %c0_22] : memref<9x8x128xf32, #tpu.memory_space<vmem>>, vector<1x8x16xf32>
    %24 = vector.shape_cast %23 : vector<1x8x16xf32> to vector<8x16xf32>
    %25 = vector.shape_cast %22 : vector<8x16xf32> to vector<1x8x16xf32>
    tpu.vector_store %arg4[%c3_20, %c0_21, %c0_22], %25 {strides = array<i32>} : memref<9x8x128xf32, #tpu.memory_space<vmem>>, vector<1x8x16xf32>,
    %c4 = arith.constant 4 : index
    %c0_23 = arith.constant 0 : index
    %c0_24 = arith.constant 0 : index
    %26 = vector.load %arg2[%c4, %c0_23, %c0_24] : memref<9x8x16xf32, #tpu.memory_space<vmem>>, vector<1x8x16xf32>
    %27 = vector.shape_cast %26 : vector<1x8x16xf32> to vector<8x16xf32>
    %c4_25 = arith.constant 4 : index
    %c0_26 = arith.constant 0 : index
    %c0_27 = arith.constant 0 : index
    %28 = vector.load %arg4[%c4_25, %c0_26, %c0_27] : memref<9x8x128xf32, #tpu.memory_space<vmem>>, vector<1x8x16xf32>
    %29 = vector.shape_cast %28 : vector<1x8x16xf32> to vector<8x16xf32>
    %30 = vector.shape_cast %27 : vector<8x16xf32> to vector<1x8x16xf32>
    tpu.vector_store %arg4[%c4_25, %c0_26, %c0_27], %30 {strides = array<i32>} : memref<9x8x128xf32, #tpu.memory_space<vmem>>, vector<1x8x16xf32>,
    %c5 = arith.constant 5 : index
    %c0_28 = arith.constant 0 : index
    %c0_29 = arith.constant 0 : index
    %31 = vector.load %arg2[%c5, %c0_28, %c0_29] : memref<9x8x16xf32, #tpu.memory_space<vmem>>, vector<1x8x16xf32>
    %32 = vector.shape_cast %31 : vector<1x8x16xf32> to vector<8x16xf32>
    %c5_30 = arith.constant 5 : index
    %c0_31 = arith.constant 0 : index
    %c0_32 = arith.constant 0 : index
    %33 = vector.load %arg4[%c5_30, %c0_31, %c0_32] : memref<9x8x128xf32, #tpu.memory_space<vmem>>, vector<1x8x16xf32>
    %34 = vector.shape_cast %33 : vector<1x8x16xf32> to vector<8x16xf32>
    %35 = vector.shape_cast %32 : vector<8x16xf32> to vector<1x8x16xf32>
    tpu.vector_store %arg4[%c5_30, %c0_31, %c0_32], %35 {strides = array<i32>} : memref<9x8x128xf32, #tpu.memory_space<vmem>>, vector<1x8x16xf32>,
    %c6 = arith.constant 6 : index
    %c0_33 = arith.constant 0 : index
    %c0_34 = arith.constant 0 : index
    %36 = vector.load %arg2[%c6, %c0_33, %c0_34] : memref<9x8x16xf32, #tpu.memory_space<vmem>>, vector<1x8x16xf32>
    %37 = vector.shape_cast %36 : vector<1x8x16xf32> to vector<8x16xf32>
    %c6_35 = arith.constant 6 : index
    %c0_36 = arith.constant 0 : index
    %c0_37 = arith.constant 0 : index
    %38 = vector.load %arg4[%c6_35, %c0_36, %c0_37] : memref<9x8x128xf32, #tpu.memory_space<vmem>>, vector<1x8x16xf32>
    %39 = vector.shape_cast %38 : vector<1x8x16xf32> to vector<8x16xf32>
    %40 = vector.shape_cast %37 : vector<8x16xf32> to vector<1x8x16xf32>
    tpu.vector_store %arg4[%c6_35, %c0_36, %c0_37], %40 {strides = array<i32>} : memref<9x8x128xf32, #tpu.memory_space<vmem>>, vector<1x8x16xf32>,
    %c7 = arith.constant 7 : index
    %c0_38 = arith.constant 0 : index
    %c0_39 = arith.constant 0 : index
    %41 = vector.load %arg2[%c7, %c0_38, %c0_39] : memref<9x8x16xf32, #tpu.memory_space<vmem>>, vector<1x8x16xf32>
    %42 = vector.shape_cast %41 : vector<1x8x16xf32> to vector<8x16xf32>
    %c7_40 = arith.constant 7 : index
    %c0_41 = arith.constant 0 : index
    %c0_42 = arith.constant 0 : index
    %43 = vector.load %arg4[%c7_40, %c0_41, %c0_42] : memref<9x8x128xf32, #tpu.memory_space<vmem>>, vector<1x8x16xf32>
    %44 = vector.shape_cast %43 : vector<1x8x16xf32> to vector<8x16xf32>
    %45 = vector.shape_cast %42 : vector<8x16xf32> to vector<1x8x16xf32>
    tpu.vector_store %arg4[%c7_40, %c0_41, %c0_42], %45 {strides = array<i32>} : memref<9x8x128xf32, #tpu.memory_space<vmem>>, vector<1x8x16xf32>,
    %c8 = arith.constant 8 : index
    %c0_43 = arith.constant 0 : index
    %c0_44 = arith.constant 0 : index
    %46 = vector.load %arg2[%c8, %c0_43, %c0_44] : memref<9x8x16xf32, #tpu.memory_space<vmem>>, vector<1x8x16xf32>
    %47 = vector.shape_cast %46 : vector<1x8x16xf32> to vector<8x16xf32>
    %c8_45 = arith.constant 8 : index
    %c0_46 = arith.constant 0 : index
    %c0_47 = arith.constant 0 : index
    %48 = vector.load %arg4[%c8_45, %c0_46, %c0_47] : memref<9x8x128xf32, #tpu.memory_space<vmem>>, vector<1x8x16xf32>
    %49 = vector.shape_cast %48 : vector<1x8x16xf32> to vector<8x16xf32>
    %50 = vector.shape_cast %47 : vector<8x16xf32> to vector<1x8x16xf32>
    tpu.vector_store %arg4[%c8_45, %c0_46, %c0_47], %50 {strides = array<i32>} : memref<9x8x128xf32, #tpu.memory_space<vmem>>, vector<1x8x16xf32>,
    %c0_48 = arith.constant 0 : index
    %c0_49 = arith.constant 0 : index
    %c0_50 = arith.constant 0 : index
    %51 = vector.load %arg4[%c0_48, %c0_49, %c0_50] : memref<9x8x128xf32, #tpu.memory_space<vmem>>, vector<1x8x128xf32>
    %52 = vector.shape_cast %51 : vector<1x8x128xf32> to vector<8x128xf32>
    %c1_51 = arith.constant 1 : index
    %c0_52 = arith.constant 0 : index
    %c0_53 = arith.constant 0 : index
    %53 = vector.load %arg4[%c1_51, %c0_52, %c0_53] : memref<9x8x128xf32, #tpu.memory_space<vmem>>, vector<1x8x128xf32>
    %54 = vector.shape_cast %53 : vector<1x8x128xf32> to vector<8x128xf32>
    %c2_54 = arith.constant 2 : index
    %c0_55 = arith.constant 0 : index
    %c0_56 = arith.constant 0 : index
    %55 = vector.load %arg4[%c2_54, %c0_55, %c0_56] : memref<9x8x128xf32, #tpu.memory_space<vmem>>, vector<1x8x128xf32>
    %56 = vector.shape_cast %55 : vector<1x8x128xf32> to vector<8x128xf32>
    %c3_57 = arith.constant 3 : index
    %c0_58 = arith.constant 0 : index
    %c0_59 = arith.constant 0 : index
    %57 = vector.load %arg4[%c3_57, %c0_58, %c0_59] : memref<9x8x128xf32, #tpu.memory_space<vmem>>, vector<1x8x128xf32>
    %58 = vector.shape_cast %57 : vector<1x8x128xf32> to vector<8x128xf32>
    %c4_60 = arith.constant 4 : index
    %c0_61 = arith.constant 0 : index
    %c0_62 = arith.constant 0 : index
    %59 = vector.load %arg4[%c4_60, %c0_61, %c0_62] : memref<9x8x128xf32, #tpu.memory_space<vmem>>, vector<1x8x128xf32>
    %60 = vector.shape_cast %59 : vector<1x8x128xf32> to vector<8x128xf32>
    %c5_63 = arith.constant 5 : index
    %c0_64 = arith.constant 0 : index
    %c0_65 = arith.constant 0 : index
    %61 = vector.load %arg4[%c5_63, %c0_64, %c0_65] : memref<9x8x128xf32, #tpu.memory_space<vmem>>, vector<1x8x128xf32>
    %62 = vector.shape_cast %61 : vector<1x8x128xf32> to vector<8x128xf32>
    %c6_66 = arith.constant 6 : index
    %c0_67 = arith.constant 0 : index
    %c0_68 = arith.constant 0 : index
    %63 = vector.load %arg4[%c6_66, %c0_67, %c0_68] : memref<9x8x128xf32, #tpu.memory_space<vmem>>, vector<1x8x128xf32>
    %64 = vector.shape_cast %63 : vector<1x8x128xf32> to vector<8x128xf32>
    %c7_69 = arith.constant 7 : index
    %c0_70 = arith.constant 0 : index
    %c0_71 = arith.constant 0 : index
    %65 = vector.load %arg4[%c7_69, %c0_70, %c0_71] : memref<9x8x128xf32, #tpu.memory_space<vmem>>, vector<1x8x128xf32>
    %66 = vector.shape_cast %65 : vector<1x8x128xf32> to vector<8x128xf32>
    %c8_72 = arith.constant 8 : index
    %c0_73 = arith.constant 0 : index
    %c0_74 = arith.constant 0 : index
    %67 = vector.load %arg4[%c8_72, %c0_73, %c0_74] : memref<9x8x128xf32, #tpu.memory_space<vmem>>, vector<1x8x128xf32>
    %68 = vector.shape_cast %67 : vector<1x8x128xf32> to vector<8x128xf32>
    %c0_75 = arith.constant 0 : index
    %c0_76 = arith.constant 0 : index
    %69 = vector.load %arg1[%c0_75, %c0_76] : memref<8x8xf32, #tpu.memory_space<vmem>>, vector<8x8xf32>
    %70 = vector.extract_strided_slice %69 {offsets = [0, 0], sizes = [8, 1], strides = [1, 1]} : vector<8x8xf32> to vector<8x1xf32>
    %71 = vector.extract_strided_slice %69 {offsets = [0, 1], sizes = [8, 1], strides = [1, 1]} : vector<8x8xf32> to vector<8x1xf32>
    %72 = vector.extract_strided_slice %69 {offsets = [0, 2], sizes = [8, 1], strides = [1, 1]} : vector<8x8xf32> to vector<8x1xf32>
    %73 = vector.extract_strided_slice %69 {offsets = [0, 3], sizes = [8, 1], strides = [1, 1]} : vector<8x8xf32> to vector<8x1xf32>
    %74 = vector.extract_strided_slice %69 {offsets = [0, 4], sizes = [8, 1], strides = [1, 1]} : vector<8x8xf32> to vector<8x1xf32>
    %75 = vector.extract_strided_slice %69 {offsets = [0, 5], sizes = [8, 1], strides = [1, 1]} : vector<8x8xf32> to vector<8x1xf32>
    %76 = vector.extract_strided_slice %69 {offsets = [0, 6], sizes = [8, 1], strides = [1, 1]} : vector<8x8xf32> to vector<8x1xf32>
    %77 = vector.broadcast %70 : vector<8x1xf32> to vector<8x128xf32>
    %78 = arith.subf %77, %64 : vector<8x128xf32>
    %cst_77 = arith.constant 1.200000e+01 : f32
    %79 = vector.broadcast %cst_77 : f32 to vector<8x128xf32>
    %80 = arith.divf %78, %79 : vector<8x128xf32>
    %cst_78 = arith.constant 1.000000e+00 : f32
    %81 = vector.broadcast %cst_78 : f32 to vector<8x128xf32>
    %82 = arith.addf %81, %80 : vector<8x128xf32>
    %83 = math.log %82 : vector<8x128xf32>
    %cst_79 = arith.constant 0.000000e+00 : f32
    %84 = vector.broadcast %cst_79 : f32 to vector<8x1xf32>
    %85 = arith.subf %84, %71 : vector<8x1xf32>
    %86 = vector.broadcast %85 : vector<8x1xf32> to vector<8x128xf32>
    %87 = arith.mulf %86, %83 : vector<8x128xf32>
    %88 = math.exp %87 : vector<8x128xf32>
    %cst_80 = arith.constant 1.000000e+00 : f32
    %89 = vector.broadcast %cst_80 : f32 to vector<8x128xf32>
    %90 = arith.subf %89, %88 : vector<8x128xf32>
    %91 = vector.broadcast %72 : vector<8x1xf32> to vector<8x128xf32>
    %92 = arith.mulf %91, %80 : vector<8x128xf32>
    %93 = arith.divf %92, %90 : vector<8x128xf32>
    %94 = vector.broadcast %71 : vector<8x1xf32> to vector<8x128xf32>
    %95 = arith.subf %1, %94 : vector<8x128xf32>
    %96 = arith.mulf %95, %83 : vector<8x128xf32>
    %97 = math.exp %96 : vector<8x128xf32>
    %98 = vector.broadcast %71 : vector<8x1xf32> to vector<8x128xf32>
    %99 = arith.cmpf ole, %1, %98 : vector<8x128xf32>
    %cst_81 = arith.constant 1.000000e+00 : f32
    %100 = vector.broadcast %cst_81 : f32 to vector<8x128xf32>
    %101 = arith.subf %100, %97 : vector<8x128xf32>
    %102 = vector.broadcast %72 : vector<8x1xf32> to vector<8x128xf32>
    %103 = arith.mulf %102, %101 : vector<8x128xf32>
    %104 = arith.divf %103, %90 : vector<8x128xf32>
    %cst_82 = arith.constant 0.000000e+00 : f32
    %105 = vector.broadcast %cst_82 : f32 to vector<8x128xf32>
    %106 = arith.select %99, %104, %105 : vector<8x128xi1>, vector<8x128xf32>
    %cst_83 = arith.constant 1.000000e+00 : f32
    %107 = vector.broadcast %cst_83 : f32 to vector<8x128xf32>
    %108 = arith.addf %1, %107 : vector<8x128xf32>
    %109 = vector.broadcast %71 : vector<8x1xf32> to vector<8x128xf32>
    %110 = arith.cmpf olt, %108, %109 : vector<8x128xf32>
    %c127_i32 = arith.constant 127 : i32
    %111 = tpu.dynamic_rotate %106 by %c127_i32 dim 1 : vector<8x128xf32>, i32 -> vector<8x128xf32>
    %cst_84 = arith.constant 0.000000e+00 : f32
    %112 = vector.broadcast %cst_84 : f32 to vector<8x128xf32>
    %113 = arith.select %110, %111, %112 : vector<8x128xi1>, vector<8x128xf32>
    %114 = arith.mulf %106, %80 : vector<8x128xf32>
    %115 = arith.subf %93, %114 : vector<8x128xf32>
    %cst_85 = arith.constant 0.000000e+00 : f32
    %116 = vector.broadcast %cst_85 : f32 to vector<8x128xf32>
    %117 = arith.select %3, %115, %116 : vector<8x128xi1>, vector<8x128xf32>
    %cst_86 = arith.constant 0.000000e+00 : f32
    %118 = vector.broadcast %cst_86 : f32 to vector<8x128xf32>
    %119 = arith.cmpf ogt, %106, %118 : vector<8x128xf32>
    %120 = arith.divf %117, %106 : vector<8x128xf32>
    %cst_87 = arith.constant 0.000000e+00 : f32
    %121 = vector.broadcast %cst_87 : f32 to vector<8x128xf32>
    %122 = arith.select %119, %120, %121 : vector<8x128xi1>, vector<8x128xf32>
    %cst_88 = arith.constant 1.000000e+00 : f32
    %123 = vector.broadcast %cst_88 : f32 to vector<8x128xf32>
    %124 = arith.subf %123, %52 : vector<8x128xf32>
    %125 = arith.subf %124, %60 : vector<8x128xf32>
    %126 = arith.subf %125, %56 : vector<8x128xf32>
    %c1_i32 = arith.constant 1 : i32
    %127 = vector.broadcast %c1_i32 : i32 to vector<8x128xi32>
    %128 = arith.cmpi sge, %0, %127 : vector<8x128xi32>
    %c1_i32_89 = arith.constant 1 : i32
    %129 = tpu.dynamic_rotate %126 by %c1_i32_89 dim 1 : vector<8x128xf32>, i32 -> vector<8x128xf32>
    %cst_90 = arith.constant 1.000000e+00 : f32
    %130 = vector.broadcast %cst_90 : f32 to vector<8x128xf32>
    %131 = arith.select %128, %129, %130 : vector<8x128xi1>, vector<8x128xf32>
    %132 = arith.mulf %126, %131 : vector<8x128xf32>
    %c2_i32 = arith.constant 2 : i32
    %133 = vector.broadcast %c2_i32 : i32 to vector<8x128xi32>
    %134 = arith.cmpi sge, %0, %133 : vector<8x128xi32>
    %c2_i32_91 = arith.constant 2 : i32
    %135 = tpu.dynamic_rotate %132 by %c2_i32_91 dim 1 : vector<8x128xf32>, i32 -> vector<8x128xf32>
    %cst_92 = arith.constant 1.000000e+00 : f32
    %136 = vector.broadcast %cst_92 : f32 to vector<8x128xf32>
    %137 = arith.select %134, %135, %136 : vector<8x128xi1>, vector<8x128xf32>
    %138 = arith.mulf %132, %137 : vector<8x128xf32>
    %c4_i32 = arith.constant 4 : i32
    %139 = vector.broadcast %c4_i32 : i32 to vector<8x128xi32>
    %140 = arith.cmpi sge, %0, %139 : vector<8x128xi32>
    %c4_i32_93 = arith.constant 4 : i32
    %141 = tpu.dynamic_rotate %138 by %c4_i32_93 dim 1 : vector<8x128xf32>, i32 -> vector<8x128xf32>
    %cst_94 = arith.constant 1.000000e+00 : f32
    %142 = vector.broadcast %cst_94 : f32 to vector<8x128xf32>
    %143 = arith.select %140, %141, %142 : vector<8x128xi1>, vector<8x128xf32>
    %144 = arith.mulf %138, %143 : vector<8x128xf32>
    %c8_i32 = arith.constant 8 : i32
    %145 = vector.broadcast %c8_i32 : i32 to vector<8x128xi32>
    %146 = arith.cmpi sge, %0, %145 : vector<8x128xi32>
    %c8_i32_95 = arith.constant 8 : i32
    %147 = tpu.dynamic_rotate %144 by %c8_i32_95 dim 1 : vector<8x128xf32>, i32 -> vector<8x128xf32>
    %cst_96 = arith.constant 1.000000e+00 : f32
    %148 = vector.broadcast %cst_96 : f32 to vector<8x128xf32>
    %149 = arith.select %146, %147, %148 : vector<8x128xi1>, vector<8x128xf32>
    %150 = arith.mulf %144, %149 : vector<8x128xf32>
    %151 = arith.mulf %72, %73 : vector<8x1xf32>
    %152 = vector.broadcast %151 : vector<8x1xf32> to vector<8x128xf32>
    %153 = arith.mulf %152, %62 : vector<8x128xf32>
    %154 = arith.mulf %122, %153 : vector<8x128xf32>
    %155 = arith.mulf %106, %150 : vector<8x128xf32>
    %cst_97 = arith.constant 9.99999996E-13 : f32
    %156 = vector.broadcast %cst_97 : f32 to vector<8x128xf32>
    %157 = arith.addf %155, %156 : vector<8x128xf32>
    %158 = arith.divf %153, %157 : vector<8x128xf32>
    %c1_i32_98 = arith.constant 1 : i32
    %159 = vector.broadcast %c1_i32_98 : i32 to vector<8x128xi32>
    %160 = arith.cmpi sge, %0, %159 : vector<8x128xi32>
    %c1_i32_99 = arith.constant 1 : i32
    %161 = tpu.dynamic_rotate %158 by %c1_i32_99 dim 1 : vector<8x128xf32>, i32 -> vector<8x128xf32>
    %cst_100 = arith.constant 0.000000e+00 : f32
    %162 = vector.broadcast %cst_100 : f32 to vector<8x128xf32>
    %163 = arith.select %160, %161, %162 : vector<8x128xi1>, vector<8x128xf32>
    %164 = arith.addf %158, %163 : vector<8x128xf32>
    %c2_i32_101 = arith.constant 2 : i32
    %165 = vector.broadcast %c2_i32_101 : i32 to vector<8x128xi32>
    %166 = arith.cmpi sge, %0, %165 : vector<8x128xi32>
    %c2_i32_102 = arith.constant 2 : i32
    %167 = tpu.dynamic_rotate %164 by %c2_i32_102 dim 1 : vector<8x128xf32>, i32 -> vector<8x128xf32>
    %cst_103 = arith.constant 0.000000e+00 : f32
    %168 = vector.broadcast %cst_103 : f32 to vector<8x128xf32>
    %169 = arith.select %166, %167, %168 : vector<8x128xi1>, vector<8x128xf32>
    %170 = arith.addf %164, %169 : vector<8x128xf32>
    %c4_i32_104 = arith.constant 4 : i32
    %171 = vector.broadcast %c4_i32_104 : i32 to vector<8x128xi32>
    %172 = arith.cmpi sge, %0, %171 : vector<8x128xi32>
    %c4_i32_105 = arith.constant 4 : i32
    %173 = tpu.dynamic_rotate %170 by %c4_i32_105 dim 1 : vector<8x128xf32>, i32 -> vector<8x128xf32>
    %cst_106 = arith.constant 0.000000e+00 : f32
    %174 = vector.broadcast %cst_106 : f32 to vector<8x128xf32>
    %175 = arith.select %172, %173, %174 : vector<8x128xi1>, vector<8x128xf32>
    %176 = arith.addf %170, %175 : vector<8x128xf32>
    %c8_i32_107 = arith.constant 8 : i32
    %177 = vector.broadcast %c8_i32_107 : i32 to vector<8x128xi32>
    %178 = arith.cmpi sge, %0, %177 : vector<8x128xi32>
    %c8_i32_108 = arith.constant 8 : i32
    %179 = tpu.dynamic_rotate %176 by %c8_i32_108 dim 1 : vector<8x128xf32>, i32 -> vector<8x128xf32>
    %cst_109 = arith.constant 0.000000e+00 : f32
    %180 = vector.broadcast %cst_109 : f32 to vector<8x128xf32>
    %181 = arith.select %178, %179, %180 : vector<8x128xi1>, vector<8x128xf32>
    %182 = arith.addf %176, %181 : vector<8x128xf32>
    %cst_110 = arith.constant 1.000000e+00 : f32
    %183 = vector.broadcast %cst_110 : f32 to vector<8x128xf32>
    %184 = arith.subf %183, %182 : vector<8x128xf32>
    %185 = arith.mulf %150, %184 : vector<8x128xf32>
    %c1_i32_111 = arith.constant 1 : i32
    %186 = vector.broadcast %c1_i32_111 : i32 to vector<8x128xi32>
    %187 = arith.cmpi sge, %0, %186 : vector<8x128xi32>
    %c1_i32_112 = arith.constant 1 : i32
    %188 = tpu.dynamic_rotate %185 by %c1_i32_112 dim 1 : vector<8x128xf32>, i32 -> vector<8x128xf32>
    %cst_113 = arith.constant 1.000000e+00 : f32
    %189 = vector.broadcast %cst_113 : f32 to vector<8x128xf32>
    %190 = arith.select %187, %188, %189 : vector<8x128xi1>, vector<8x128xf32>
    %191 = arith.mulf %190, %106 : vector<8x128xf32>
    %192 = arith.mulf %185, %113 : vector<8x128xf32>
    %193 = arith.mulf %190, %117 : vector<8x128xf32>
    %cst_114 = arith.constant 1.000000e+00 : f32
    %194 = vector.broadcast %cst_114 : f32 to vector<8x128xf32>
    %195 = arith.subf %194, %56 : vector<8x128xf32>
    %196 = arith.mulf %193, %195 : vector<8x128xf32>
    %197 = arith.mulf %196, %54 : vector<8x128xf32>
    %cst_115 = arith.constant 1.000000e+00 : f32
    %198 = vector.broadcast %cst_115 : f32 to vector<8x128xf32>
    %199 = arith.subf %198, %66 : vector<8x128xf32>
    %200 = arith.mulf %197, %199 : vector<8x128xf32>
    %201 = arith.mulf %193, %56 : vector<8x128xf32>
    %202 = arith.addf %201, %154 : vector<8x128xf32>
    %203 = arith.subf %193, %200 : vector<8x128xf32>
    %204 = arith.subf %203, %202 : vector<8x128xf32>
    %205 = arith.mulf %190, %113 : vector<8x128xf32>
    %206 = arith.mulf %205, %52 : vector<8x128xf32>
    %207 = arith.mulf %191, %56 : vector<8x128xf32>
    %208 = arith.addf %207, %153 : vector<8x128xf32>
    %cst_116 = arith.constant 0.000000e+00 : f32
    %209 = vector.broadcast %cst_116 : f32 to vector<8x128xf32>
    %cst_117 = arith.constant 0.000000e+00 : f32
    %210 = vector.broadcast %cst_117 : f32 to vector<8x1xf32>
    %211 = arith.cmpf oeq, %76, %210 : vector<8x1xf32>
    %cst_118 = arith.constant 0.000000e+00 : f32
    %212 = vector.shape_cast %211 : vector<8x1xi1> to vector<8x1xi1>
    %213 = vector.broadcast %212 : vector<8x1xi1> to vector<8x128xi1>
    %214 = vector.broadcast %cst_118 : f32 to vector<8x128xf32>
    %215 = arith.select %213, %208, %214 : vector<8x128xi1>, vector<8x128xf32>
    %216 = arith.addf %209, %215 : vector<8x128xf32>
    %c1_i32_119 = arith.constant 1 : i32
    %217 = vector.broadcast %c1_i32_119 : i32 to vector<8x128xi32>
    %218 = arith.cmpi sge, %0, %217 : vector<8x128xi32>
    %c1_i32_120 = arith.constant 1 : i32
    %219 = tpu.dynamic_rotate %208 by %c1_i32_120 dim 1 : vector<8x128xf32>, i32 -> vector<8x128xf32>
    %cst_121 = arith.constant 0.000000e+00 : f32
    %220 = vector.broadcast %cst_121 : f32 to vector<8x128xf32>
    %221 = arith.select %218, %219, %220 : vector<8x128xi1>, vector<8x128xf32>
    %cst_122 = arith.constant 1.000000e+00 : f32
    %222 = vector.broadcast %cst_122 : f32 to vector<8x1xf32>
    %223 = arith.cmpf oeq, %76, %222 : vector<8x1xf32>
    %cst_123 = arith.constant 0.000000e+00 : f32
    %224 = vector.shape_cast %223 : vector<8x1xi1> to vector<8x1xi1>
    %225 = vector.broadcast %224 : vector<8x1xi1> to vector<8x128xi1>
    %226 = vector.broadcast %cst_123 : f32 to vector<8x128xf32>
    %227 = arith.select %225, %221, %226 : vector<8x128xi1>, vector<8x128xf32>
    %228 = arith.addf %216, %227 : vector<8x128xf32>
    %c2_i32_124 = arith.constant 2 : i32
    %229 = vector.broadcast %c2_i32_124 : i32 to vector<8x128xi32>
    %230 = arith.cmpi sge, %0, %229 : vector<8x128xi32>
    %c2_i32_125 = arith.constant 2 : i32
    %231 = tpu.dynamic_rotate %208 by %c2_i32_125 dim 1 : vector<8x128xf32>, i32 -> vector<8x128xf32>
    %cst_126 = arith.constant 0.000000e+00 : f32
    %232 = vector.broadcast %cst_126 : f32 to vector<8x128xf32>
    %233 = arith.select %230, %231, %232 : vector<8x128xi1>, vector<8x128xf32>
    %cst_127 = arith.constant 2.000000e+00 : f32
    %234 = vector.broadcast %cst_127 : f32 to vector<8x1xf32>
    %235 = arith.cmpf oeq, %76, %234 : vector<8x1xf32>
    %cst_128 = arith.constant 0.000000e+00 : f32
    %236 = vector.shape_cast %235 : vector<8x1xi1> to vector<8x1xi1>
    %237 = vector.broadcast %236 : vector<8x1xi1> to vector<8x128xi1>
    %238 = vector.broadcast %cst_128 : f32 to vector<8x128xf32>
    %239 = arith.select %237, %233, %238 : vector<8x128xi1>, vector<8x128xf32>
    %240 = arith.addf %228, %239 : vector<8x128xf32>
    %241 = vector.extract_strided_slice %58 {offsets = [0, 15], sizes = [8, 1], strides = [1, 1]} : vector<8x128xf32> to vector<8x1xf32>
    %242 = vector.shape_cast %241 : vector<8x1xf32> to vector<8x1xf32>
    %243 = vector.broadcast %242 : vector<8x1xf32> to vector<8x128xf32>
    %244 = arith.select %3, %58, %243 : vector<8x128xi1>, vector<8x128xf32>
    %cst_129 = arith.constant 1.000000e+00 : f32
    %245 = vector.broadcast %cst_129 : f32 to vector<8x128xf32>
    %246 = arith.subf %245, %244 : vector<8x128xf32>
    %247 = arith.mulf %240, %246 : vector<8x128xf32>
    %248 = arith.mulf %190, %113 : vector<8x128xf32>
    %249 = arith.mulf %248, %60 : vector<8x128xf32>
    %250 = arith.addf %204, %206 : vector<8x128xf32>
    %251 = arith.addf %250, %247 : vector<8x128xf32>
    %252 = arith.mulf %206, %80 : vector<8x128xf32>
    %253 = vector.broadcast %74 : vector<8x1xf32> to vector<8x128xf32>
    %254 = arith.mulf %252, %253 : vector<8x128xf32>
    %255 = arith.mulf %249, %80 : vector<8x128xf32>
    %256 = arith.subf %208, %240 : vector<8x128xf32>
    %c1_i32_130 = arith.constant 1 : i32
    %257 = vector.broadcast %c1_i32_130 : i32 to vector<8x128xi32>
    %258 = arith.cmpi sge, %0, %257 : vector<8x128xi32>
    %c1_i32_131 = arith.constant 1 : i32
    %259 = tpu.dynamic_rotate %256 by %c1_i32_131 dim 1 : vector<8x128xf32>, i32 -> vector<8x128xf32>
    %cst_132 = arith.constant 0.000000e+00 : f32
    %260 = vector.broadcast %cst_132 : f32 to vector<8x128xf32>
    %261 = arith.select %258, %259, %260 : vector<8x128xi1>, vector<8x128xf32>
    %262 = arith.addf %256, %261 : vector<8x128xf32>
    %c2_i32_133 = arith.constant 2 : i32
    %263 = vector.broadcast %c2_i32_133 : i32 to vector<8x128xi32>
    %264 = arith.cmpi sge, %0, %263 : vector<8x128xi32>
    %c2_i32_134 = arith.constant 2 : i32
    %265 = tpu.dynamic_rotate %262 by %c2_i32_134 dim 1 : vector<8x128xf32>, i32 -> vector<8x128xf32>
    %cst_135 = arith.constant 0.000000e+00 : f32
    %266 = vector.broadcast %cst_135 : f32 to vector<8x128xf32>
    %267 = arith.select %264, %265, %266 : vector<8x128xi1>, vector<8x128xf32>
    %268 = arith.addf %262, %267 : vector<8x128xf32>
    %c4_i32_136 = arith.constant 4 : i32
    %269 = vector.broadcast %c4_i32_136 : i32 to vector<8x128xi32>
    %270 = arith.cmpi sge, %0, %269 : vector<8x128xi32>
    %c4_i32_137 = arith.constant 4 : i32
    %271 = tpu.dynamic_rotate %268 by %c4_i32_137 dim 1 : vector<8x128xf32>, i32 -> vector<8x128xf32>
    %cst_138 = arith.constant 0.000000e+00 : f32
    %272 = vector.broadcast %cst_138 : f32 to vector<8x128xf32>
    %273 = arith.select %270, %271, %272 : vector<8x128xi1>, vector<8x128xf32>
    %274 = arith.addf %268, %273 : vector<8x128xf32>
    %c8_i32_139 = arith.constant 8 : i32
    %275 = vector.broadcast %c8_i32_139 : i32 to vector<8x128xi32>
    %276 = arith.cmpi sge, %0, %275 : vector<8x128xi32>
    %c8_i32_140 = arith.constant 8 : i32
    %277 = tpu.dynamic_rotate %274 by %c8_i32_140 dim 1 : vector<8x128xf32>, i32 -> vector<8x128xf32>
    %cst_141 = arith.constant 0.000000e+00 : f32
    %278 = vector.broadcast %cst_141 : f32 to vector<8x128xf32>
    %279 = arith.select %276, %277, %278 : vector<8x128xi1>, vector<8x128xf32>
    %280 = arith.addf %274, %279 : vector<8x128xf32>
    %c16_i32_142 = arith.constant 16 : i32
    %281 = vector.broadcast %c16_i32_142 : i32 to vector<8x128xi32>
    %282 = arith.cmpi sge, %0, %281 : vector<8x128xi32>
    %c16_i32_143 = arith.constant 16 : i32
    %283 = tpu.dynamic_rotate %280 by %c16_i32_143 dim 1 : vector<8x128xf32>, i32 -> vector<8x128xf32>
    %cst_144 = arith.constant 0.000000e+00 : f32
    %284 = vector.broadcast %cst_144 : f32 to vector<8x128xf32>
    %285 = arith.select %282, %283, %284 : vector<8x128xi1>, vector<8x128xf32>
    %286 = arith.addf %280, %285 : vector<8x128xf32>
    %cst_145 = arith.constant 0.000000e+00 : f32
    %287 = vector.broadcast %cst_145 : f32 to vector<8x128xf32>
    %288 = arith.maximumf %286, %287 : vector<8x128xf32>
    %c1_i32_146 = arith.constant 1 : i32
    %289 = vector.broadcast %c1_i32_146 : i32 to vector<8x128xi32>
    %290 = arith.cmpi sge, %0, %289 : vector<8x128xi32>
    %c1_i32_147 = arith.constant 1 : i32
    %291 = tpu.dynamic_rotate %288 by %c1_i32_147 dim 1 : vector<8x128xf32>, i32 -> vector<8x128xf32>
    %cst_148 = arith.constant 0.000000e+00 : f32
    %292 = vector.broadcast %cst_148 : f32 to vector<8x128xf32>
    %293 = arith.select %290, %291, %292 : vector<8x128xi1>, vector<8x128xf32>
    %294 = arith.addf %191, %293 : vector<8x128xf32>
    %295 = arith.addf %192, %288 : vector<8x128xf32>
    %cst_149 = arith.constant 0.0833333358 : f32
    %296 = vector.broadcast %cst_149 : f32 to vector<8x1xf32>
    %297 = arith.mulf %75, %296 : vector<8x1xf32>
    %298 = arith.addf %294, %295 : vector<8x128xf32>
    %cst_150 = arith.constant 5.000000e-01 : f32
    %299 = vector.broadcast %cst_150 : f32 to vector<8x128xf32>
    %300 = arith.mulf %298, %299 : vector<8x128xf32>
    %301 = vector.broadcast %297 : vector<8x1xf32> to vector<8x128xf32>
    %302 = arith.mulf %300, %301 : vector<8x128xf32>
    %cst_151 = arith.constant 1.000000e+00 : f32
    %303 = vector.broadcast %cst_151 : f32 to vector<8x128xf32>
    %304 = arith.subf %303, %56 : vector<8x128xf32>
    %305 = arith.mulf %304, %54 : vector<8x128xf32>
    %cst_152 = arith.constant 1.000000e+00 : f32
    %306 = vector.broadcast %cst_152 : f32 to vector<8x128xf32>
    %307 = arith.subf %306, %68 : vector<8x128xf32>
    %308 = arith.mulf %305, %307 : vector<8x128xf32>
    %cst_153 = arith.constant 1.000000e+00 : f32
    %309 = vector.broadcast %cst_153 : f32 to vector<8x128xf32>
    %310 = arith.subf %309, %308 : vector<8x128xf32>
    %311 = arith.subf %310, %56 : vector<8x128xf32>
    %312 = arith.mulf %191, %311 : vector<8x128xf32>
    %313 = arith.subf %312, %153 : vector<8x128xf32>
    %314 = arith.mulf %80, %313 : vector<8x128xf32>
    %315 = arith.subf %314, %254 : vector<8x128xf32>
    %316 = arith.subf %315, %255 : vector<8x128xf32>
    %317 = arith.addf %251, %316 : vector<8x128xf32>
    %318 = arith.addf %200, %202 : vector<8x128xf32>
    %319 = arith.addf %318, %208 : vector<8x128xf32>
    %cst_154 = arith.constant 1.000000e+00 : f32
    %320 = vector.broadcast %cst_154 : f32 to vector<8x128xf32>
    %321 = arith.addf %1, %320 : vector<8x128xf32>
    %c0_155 = arith.constant 0 : index
    %c0_156 = arith.constant 0 : index
    %c0_157 = arith.constant 0 : index
    %322 = vector.load %arg3[%c0_155, %c0_156, %c0_157] : memref<14x8x128xf32, #tpu.memory_space<vmem>>, vector<1x8x128xf32>
    %323 = vector.shape_cast %322 : vector<1x8x128xf32> to vector<8x128xf32>
    %324 = vector.shape_cast %321 : vector<8x128xf32> to vector<1x8x128xf32>
    tpu.vector_store %arg3[%c0_155, %c0_156, %c0_157], %324 {strides = array<i32>} : memref<14x8x128xf32, #tpu.memory_space<vmem>>, vector<1x8x128xf32>,
    %c1_158 = arith.constant 1 : index
    %c0_159 = arith.constant 0 : index
    %c0_160 = arith.constant 0 : index
    %325 = vector.load %arg3[%c1_158, %c0_159, %c0_160] : memref<14x8x128xf32, #tpu.memory_space<vmem>>, vector<1x8x128xf32>
    %326 = vector.shape_cast %325 : vector<1x8x128xf32> to vector<8x128xf32>
    %327 = vector.shape_cast %251 : vector<8x128xf32> to vector<1x8x128xf32>
    tpu.vector_store %arg3[%c1_158, %c0_159, %c0_160], %327 {strides = array<i32>} : memref<14x8x128xf32, #tpu.memory_space<vmem>>, vector<1x8x128xf32>,
    %c2_161 = arith.constant 2 : index
    %c0_162 = arith.constant 0 : index
    %c0_163 = arith.constant 0 : index
    %328 = vector.load %arg3[%c2_161, %c0_162, %c0_163] : memref<14x8x128xf32, #tpu.memory_space<vmem>>, vector<1x8x128xf32>
    %329 = vector.shape_cast %328 : vector<1x8x128xf32> to vector<8x128xf32>
    %330 = vector.shape_cast %204 : vector<8x128xf32> to vector<1x8x128xf32>
    tpu.vector_store %arg3[%c2_161, %c0_162, %c0_163], %330 {strides = array<i32>} : memref<14x8x128xf32, #tpu.memory_space<vmem>>, vector<1x8x128xf32>,
    %c3_164 = arith.constant 3 : index
    %c0_165 = arith.constant 0 : index
    %c0_166 = arith.constant 0 : index
    %331 = vector.load %arg3[%c3_164, %c0_165, %c0_166] : memref<14x8x128xf32, #tpu.memory_space<vmem>>, vector<1x8x128xf32>
    %332 = vector.shape_cast %331 : vector<1x8x128xf32> to vector<8x128xf32>
    %333 = vector.shape_cast %206 : vector<8x128xf32> to vector<1x8x128xf32>
    tpu.vector_store %arg3[%c3_164, %c0_165, %c0_166], %333 {strides = array<i32>} : memref<14x8x128xf32, #tpu.memory_space<vmem>>, vector<1x8x128xf32>,
    %c4_167 = arith.constant 4 : index
    %c0_168 = arith.constant 0 : index
    %c0_169 = arith.constant 0 : index
    %334 = vector.load %arg3[%c4_167, %c0_168, %c0_169] : memref<14x8x128xf32, #tpu.memory_space<vmem>>, vector<1x8x128xf32>
    %335 = vector.shape_cast %334 : vector<1x8x128xf32> to vector<8x128xf32>
    %336 = vector.shape_cast %249 : vector<8x128xf32> to vector<1x8x128xf32>
    tpu.vector_store %arg3[%c4_167, %c0_168, %c0_169], %336 {strides = array<i32>} : memref<14x8x128xf32, #tpu.memory_space<vmem>>, vector<1x8x128xf32>,
    %c5_170 = arith.constant 5 : index
    %c0_171 = arith.constant 0 : index
    %c0_172 = arith.constant 0 : index
    %337 = vector.load %arg3[%c5_170, %c0_171, %c0_172] : memref<14x8x128xf32, #tpu.memory_space<vmem>>, vector<1x8x128xf32>
    %338 = vector.shape_cast %337 : vector<1x8x128xf32> to vector<8x128xf32>
    %339 = vector.shape_cast %208 : vector<8x128xf32> to vector<1x8x128xf32>
    tpu.vector_store %arg3[%c5_170, %c0_171, %c0_172], %339 {strides = array<i32>} : memref<14x8x128xf32, #tpu.memory_space<vmem>>, vector<1x8x128xf32>,
    %c6_173 = arith.constant 6 : index
    %c0_174 = arith.constant 0 : index
    %c0_175 = arith.constant 0 : index
    %340 = vector.load %arg3[%c6_173, %c0_174, %c0_175] : memref<14x8x128xf32, #tpu.memory_space<vmem>>, vector<1x8x128xf32>
    %341 = vector.shape_cast %340 : vector<1x8x128xf32> to vector<8x128xf32>
    %342 = vector.shape_cast %240 : vector<8x128xf32> to vector<1x8x128xf32>
    tpu.vector_store %arg3[%c6_173, %c0_174, %c0_175], %342 {strides = array<i32>} : memref<14x8x128xf32, #tpu.memory_space<vmem>>, vector<1x8x128xf32>,
    %c7_176 = arith.constant 7 : index
    %c0_177 = arith.constant 0 : index
    %c0_178 = arith.constant 0 : index
    %343 = vector.load %arg3[%c7_176, %c0_177, %c0_178] : memref<14x8x128xf32, #tpu.memory_space<vmem>>, vector<1x8x128xf32>
    %344 = vector.shape_cast %343 : vector<1x8x128xf32> to vector<8x128xf32>
    %345 = vector.shape_cast %247 : vector<8x128xf32> to vector<1x8x128xf32>
    tpu.vector_store %arg3[%c7_176, %c0_177, %c0_178], %345 {strides = array<i32>} : memref<14x8x128xf32, #tpu.memory_space<vmem>>, vector<1x8x128xf32>,
    %c8_179 = arith.constant 8 : index
    %c0_180 = arith.constant 0 : index
    %c0_181 = arith.constant 0 : index
    %346 = vector.load %arg3[%c8_179, %c0_180, %c0_181] : memref<14x8x128xf32, #tpu.memory_space<vmem>>, vector<1x8x128xf32>
    %347 = vector.shape_cast %346 : vector<1x8x128xf32> to vector<8x128xf32>
    %348 = vector.shape_cast %316 : vector<8x128xf32> to vector<1x8x128xf32>
    tpu.vector_store %arg3[%c8_179, %c0_180, %c0_181], %348 {strides = array<i32>} : memref<14x8x128xf32, #tpu.memory_space<vmem>>, vector<1x8x128xf32>,
    %c9 = arith.constant 9 : index
    %c0_182 = arith.constant 0 : index
    %c0_183 = arith.constant 0 : index
    %349 = vector.load %arg3[%c9, %c0_182, %c0_183] : memref<14x8x128xf32, #tpu.memory_space<vmem>>, vector<1x8x128xf32>
    %350 = vector.shape_cast %349 : vector<1x8x128xf32> to vector<8x128xf32>
    %351 = vector.shape_cast %302 : vector<8x128xf32> to vector<1x8x128xf32>
    tpu.vector_store %arg3[%c9, %c0_182, %c0_183], %351 {strides = array<i32>} : memref<14x8x128xf32, #tpu.memory_space<vmem>>, vector<1x8x128xf32>,
    %c10 = arith.constant 10 : index
    %c0_184 = arith.constant 0 : index
    %c0_185 = arith.constant 0 : index
    %352 = vector.load %arg3[%c10, %c0_184, %c0_185] : memref<14x8x128xf32, #tpu.memory_space<vmem>>, vector<1x8x128xf32>
    %353 = vector.shape_cast %352 : vector<1x8x128xf32> to vector<8x128xf32>
    %354 = vector.shape_cast %191 : vector<8x128xf32> to vector<1x8x128xf32>
    tpu.vector_store %arg3[%c10, %c0_184, %c0_185], %354 {strides = array<i32>} : memref<14x8x128xf32, #tpu.memory_space<vmem>>, vector<1x8x128xf32>,
    %c11 = arith.constant 11 : index
    %c0_186 = arith.constant 0 : index
    %c0_187 = arith.constant 0 : index
    %355 = vector.load %arg3[%c11, %c0_186, %c0_187] : memref<14x8x128xf32, #tpu.memory_space<vmem>>, vector<1x8x128xf32>
    %356 = vector.shape_cast %355 : vector<1x8x128xf32> to vector<8x128xf32>
    %357 = vector.shape_cast %192 : vector<8x128xf32> to vector<1x8x128xf32>
    tpu.vector_store %arg3[%c11, %c0_186, %c0_187], %357 {strides = array<i32>} : memref<14x8x128xf32, #tpu.memory_space<vmem>>, vector<1x8x128xf32>,
    %c12 = arith.constant 12 : index
    %c0_188 = arith.constant 0 : index
    %c0_189 = arith.constant 0 : index
    %358 = vector.load %arg3[%c12, %c0_188, %c0_189] : memref<14x8x128xf32, #tpu.memory_space<vmem>>, vector<1x8x128xf32>
    %359 = vector.shape_cast %358 : vector<1x8x128xf32> to vector<8x128xf32>
    %360 = vector.shape_cast %317 : vector<8x128xf32> to vector<1x8x128xf32>
    tpu.vector_store %arg3[%c12, %c0_188, %c0_189], %360 {strides = array<i32>} : memref<14x8x128xf32, #tpu.memory_space<vmem>>, vector<1x8x128xf32>,
    %c13 = arith.constant 13 : index
    %c0_190 = arith.constant 0 : index
    %c0_191 = arith.constant 0 : index
    %361 = vector.load %arg3[%c13, %c0_190, %c0_191] : memref<14x8x128xf32, #tpu.memory_space<vmem>>, vector<1x8x128xf32>
    %362 = vector.shape_cast %361 : vector<1x8x128xf32> to vector<8x128xf32>
    %363 = vector.shape_cast %319 : vector<8x128xf32> to vector<1x8x128xf32>
    tpu.vector_store %arg3[%c13, %c0_190, %c0_191], %363 {strides = array<i32>} : memref<14x8x128xf32, #tpu.memory_space<vmem>>, vector<1x8x128xf32>,
    return
  }
  func.func @transform_0(%arg0: i32) -> (i32, i32) {
    %c0_i32 = arith.constant 0 : i32
    %c0_i32_0 = arith.constant 0 : i32
    return %arg0, %c0_i32 : i32, i32
  }
  func.func @transform_1(%arg0: i32) -> (i32, i32, i32) {
    %c0_i32 = arith.constant 0 : i32
    %c0_i32_0 = arith.constant 0 : i32
    %c0_i32_1 = arith.constant 0 : i32
    return %c0_i32, %arg0, %c0_i32_0 : i32, i32, i32
  }
  func.func @transform_2(%arg0: i32) -> (i32, i32, i32) {
    %c0_i32 = arith.constant 0 : i32
    %c0_i32_0 = arith.constant 0 : i32
    %c0_i32_1 = arith.constant 0 : i32
    return %c0_i32, %arg0, %c0_i32_0 : i32, i32, i32
  }
}

</mosaic_0001>

<bundles_post_ra>
// kernel: tpu_custom_call.1
= control target key start
LH: loop header
LB: loop body
LE: loop exit
PB: predicated region body
PF: predicated region fallthrough
CT: control target
= control target key end

     0   :  { %7 = vsyncpa [#allocation4], 0  ;;  %s724_s0 = inlined_call_operand.hbm [shape: f32[8,8], index: 0, kind: input, shape index: {}]   ;;  %s725_s1 = inlined_call_operand.hbm [shape: f32[9,8,16], index: 1, kind: input, shape index: {}]   ;;  %s726_s2 = inlined_call_operand.hbm [shape: f32[14,8,128], index: 2, kind: output, shape index: {}]  }
   0x1   :  { %8 = vsyncpa [#allocation7], 0 }
   0x2   :  { %9 = vsyncpa [#allocation5], 0  ;;  %s480_s9 = smov [#allocation3]   ;;  %s481_s11 = smov [#allocation6]  }
   0x3   :  { %s16_s10 = sshll.u32 %s480_s9, 4  ;;  %s25_s12 = sshll.u32 %s481_s11, 4  ;;  %s17_s10 = int_to_ptr.vmem [resolvable:$true] %s16_s10  ;;  %s513_s12 = int_to_ptr.vmem [resolvable:$true] %s25_s12 }
   0x4   :  { %s408_s15 = scalar_lea.hbm %s724_s0, 128 }
   0x5   :  { %p409_p0 = scmp.ne.s32.totalorder %s724_s0, %s408_s15  ;;  %p412_p1 = scmp.lt.u32.totalorder %s408_s15, %s724_s0 }
   0x7   :  { %p414_p2 = pnand %p412_p1, %p409_p0 }
   0x9   :  { %417 = shalt.err (!%p414_p2)
}
   0xa   :  { %s418_s20 = scalar_lea.vmem %s17_s10, 128  ;;  %p423_p4 = scmp.lt.s32.totalorder %s17_s10, %s17_s10 }
   0xb   :  { %p419_p3 = scmp.ne.s32.totalorder %s17_s10, %s418_s20  ;;  %p424_p5 = scmp.lt.s32.totalorder %s418_s20, %s418_s20 }
   0xd   :  { %p425_p6 = por %p424_p5, %p423_p4 }
   0xf   :  { %p426_p7 = pnand %p425_p6, %p419_p3 }
  0x11   :  { %429 = shalt.err (!%p426_p7)
}
  0x12   :  { %19 = dma.hbm_to_vmem [thread:$0]  %s724_s0, 128, %s17_s10, [#allocation4]  }
  0x13   :  { %s430_s25 = scalar_lea.hbm %s725_s1, 1152 }
  0x14   :  { %p431_p8 = scmp.ne.s32.totalorder %s725_s1, %s430_s25  ;;  %p434_p9 = scmp.lt.u32.totalorder %s430_s25, %s725_s1 }
  0x16   :  { %p436_p10 = pnand %p434_p9, %p431_p8 }
  0x18   :  { %439 = shalt.err (!%p436_p10)
}
  0x19   :  { %s440_s30 = scalar_lea.vmem %s513_s12, 1152  ;;  %p445_p12 = scmp.lt.s32.totalorder %s513_s12, %s513_s12 }
  0x1a   :  { %p441_p11 = scmp.ne.s32.totalorder %s513_s12, %s440_s30  ;;  %p446_p13 = scmp.lt.s32.totalorder %s440_s30, %s440_s30 }
  0x1c   :  { %p447_p0 = por %p446_p13, %p445_p12 }
  0x1e   :  { %p448_p1 = pnand %p447_p0, %p441_p11 }
  0x20   :  { %451 = shalt.err (!%p448_p1)
}
  0x21   :  { %s482_s0 = smov 128   ;;  %s483_s3 = smov 8  }
  0x22   :  { %31 = dma.hbm_to_vmem [thread:$0]  %s725_s1, 1152, %s513_s12, [#allocation7], %s482_s0, %s482_s0, %s483_s3  }
  0x23   :  { %474 = dma.done.wait [#allocation4], 128  }
  0x24   :  { %475 = vsyncadd [#allocation4], 4294967168 }
  0x25   :  { %476 = dma.done.wait [#allocation7], 1152  }
  0x26   :  { %477 = vsyncadd [#allocation7], 4294966144  ;;  %v484_v0 = vmov 0.0   ;;  %vm52_vm0 = vcmask 130048   ;;  %v51_v1 = vld [vmem:[#allocation6] sm:$0xff]  ;;  %v59_v2 = vld [vmem:[#allocation6 + $0x10] sm:$0xff]  ;;  %v38_v10 = vlaneseq }
  0x27   :  { %42 = vst [vmem:[#allocation2] sm:$0xff] %v484_v0  ;;  %44 = vst [vmem:[#allocation2 + $0x10] sm:$0xff] %v484_v0  ;;  %v67_v3 = vld [vmem:[#allocation6 + $0x20] sm:$0xff]  ;;  %s485_s1 = smov 1   ;;  %v486_v12 = vmov 0   ;;  %v487_v13 = vmov 1  }
  0x28   :  { %46 = vst [vmem:[#allocation2 + $0x20] sm:$0xff] %v484_v0  ;;  %43 = vst [vmem:[#allocation2 + $0x8] sm:$0xff] %v484_v0  ;;  %v560_v11 = vand.u32 127, %v38_v10  ;;  %385 = vset.pattern.permute.xlu1 %v486_v12  ;;  %387 = vset.pattern.permute.xlu0 %v487_v13  ;;  %s488_s6 = smov 2   ;;  %v567_v17 = vld [vmem:[#allocation3] sm:$0xff]  ;;  %s489_s7 = smov 127  }
  0x29   :  { %45 = vst [vmem:[#allocation2 + $0x18] sm:$0xff] %v484_v0  ;;  %47 = vst [vmem:[#allocation2 + $0x28] sm:$0xff] %v484_v0  ;;  %v490_v18 = vmov 2   ;;  %v75_v19 = vld [vmem:[#allocation6 + $0x30] sm:$0xff]  ;;  %s491_s8 = smov 4   ;;  %v107_v25 = vsub.f32 0.0, %v567_v17 }
  0x2a   :  { %48 = vst [vmem:[#allocation2 + $0x30] sm:$0xff] %v484_v0  ;;  %49 = vst [vmem:[#allocation2 + $0x38] sm:$0xff] %v484_v0  ;;  %vm152_vm1 = vcmp.ge.s32.totalorder %v560_v11, 1  ;;  %vm157_vm2 = vcmp.ge.s32.totalorder %v560_v11, 2  ;;  %v71_v26 = vld [vmem:[#allocation6 + $0x28] sm:$0xff]  ;;  %v40_v27 = vcvt.s32.f32 %v560_v11  ;;  %vm162_vm3 = vcmp.ge.s32.totalorder %v560_v11, 4 }
  0x2b   :  { %50 = vst [vmem:[#allocation2 + $0x40] sm:$0xff] %v484_v0  ;;  %53 = vst.msk [vmem:[#allocation2] sm:$0xff] %vm52_vm0, %v51_v1  ;;  %vm167_vm4 = vcmp.ge.s32.totalorder %v560_v11, 8  ;;  %vm224_vm6 = vcmp.eq.f32.partialorder %v567_v17, 0.0  ;;  %vm246_vm7 = vcmp.eq.f32.partialorder %v567_v17, 2.0  ;;  %vm235_vm8 = vcmp.eq.f32.partialorder %v567_v17, 1.0 }
  0x2c   :  { %61 = vst.msk [vmem:[#allocation2 + $0x10] sm:$0xff] %vm52_vm0, %v59_v2  ;;  %69 = vst.msk [vmem:[#allocation2 + $0x20] sm:$0xff] %vm52_vm0, %v67_v3  ;;  %v583_v28 = vadd.f32 1.0, %v40_v27  ;;  %vm41_vm9 = vcmp.lt.s32.totalorder %v560_v11, 16  ;;  %s496_s9 = smov 16   ;;  %vm289_vm14 = vcmp.ge.s32.totalorder %v560_v11, 16 }
  0x2d   :  { %77 = vst.msk [vmem:[#allocation2 + $0x30] sm:$0xff] %vm52_vm0, %v75_v19  ;;  %73 = vst.msk [vmem:[#allocation2 + $0x28] sm:$0xff] %vm52_vm0, %v71_v26  ;;  %v225_v19 = vsel %vm224_vm6, 1, %v486_v12  ;;  %s497_s10 = smov [#allocation8]  }
  0x2e   :  { %322 = vst [vmem:[#allocation8] sm:$0xff] %v583_v28  ;;  %s354_s11 = sshll.u32 %s497_s10, 4  ;;  %s355_s11 = int_to_ptr.vmem [resolvable:$true] %s354_s11 }
  0x2f   :  { %s452_s12 = scalar_lea.vmem %s355_s11, 1792  ;;  %p457_p3 = scmp.lt.s32.totalorder %s355_s11, %s355_s11 }
  0x30   :  { %p453_p2 = scmp.ne.s32.totalorder %s355_s11, %s452_s12  ;;  %p458_p4 = scmp.lt.s32.totalorder %s452_s12, %s452_s12 }
  0x32   :  { %v550_v4 = vld [vmem:[#allocation2] sm:$0xff]  ;;  %p459_p5 = por %p458_p4, %p457_p3 }
  0x33   :  { %v552_v5 = vld [vmem:[#allocation2 + $0x20] sm:$0xff]  ;;  %v149_v6 = vsub.f32 1.0, %v550_v4  ;;  %v555_v7 = vld [vmem:[#allocation2 + $0x10] sm:$0xff] }
  0x34   :  { %v92_v32 = vld [vmem:[#allocation2 + $0x30] sm:$0xff]  ;;  %v91_v60 = vld [vmem:[#allocation2 + $0x28] sm:$0xff]  ;;  %p460_p6 = pnand %p459_p5, %p453_p2 }
  0x35   :  { %v150_v8 = vsub.f32 %v149_v6, %v552_v5  ;;  %v492_v6 = vmov 6  }
  0x37   :  { %v151_v9 = vsub.f32 %v150_v8, %v555_v7 }
  0x39   :  { %153 = vrot.lane.b32.xlu0 %v151_v9, %s485_s1 }
  0xab   :  { %v154_v14 = vpop.permute.xlu0 %153 }
  0xac   :  { %v155_v15 = vsel %vm152_vm1, %v154_v14, 1.0 }
  0xad   :  { %v156_v16 = vmul.f32 %v155_v15, %v151_v9 }
  0xaf   :  { %158 = vrot.lane.b32.xlu0 %v156_v16, %s488_s6 }
  0xb3   :  { %172 = vrot.lane.b32.xlu0 %v567_v17, %s489_s7 }
  0xb7   :  { %125 = vperm.xlu0 %387, %v567_v17  }
  0xbb   :  { %389 = vset.pattern.permute.xlu0 %v490_v18 }
 0x121   :  { %v159_v20 = vpop.permute.xlu0 %158 }
 0x122   :  { %v160_v21 = vsel %vm157_vm2, %v159_v20, 1.0  ;;  %v247_v20 = vsel %vm246_vm7, 1, %v486_v12 }
 0x123   :  { %v161_v22 = vmul.f32 %v160_v21, %v156_v16  ;;  %v55_v16 = vld [vmem:[#allocation6 + $0x8] sm:$0xff]  ;;  %v83_v21 = vld [vmem:[#allocation6 + $0x40] sm:$0xff] }
 0x124   :  { %57 = vst.msk [vmem:[#allocation2 + $0x8] sm:$0xff] %vm52_vm0, %v55_v16  ;;  %85 = vst.msk [vmem:[#allocation2 + $0x40] sm:$0xff] %vm52_vm0, %v83_v21 }
 0x125   :  { %163 = vrot.lane.b32.xlu1 %v161_v22, %s491_s8  ;;  %v173_v23 = vpop.permute.xlu0 %172 }
 0x126   :  { %v175_v24 = vmul.f32 %v173_v23, %v567_v17 }
 0x128   :  { %178 = vperm.xlu0 %389, %v175_v24  }
 0x129   :  { %98 = vperm.xlu1 %385, %v567_v17  }
 0x12c   :  { %391 = vset.pattern.permute.xlu0 %v492_v6 }
 0x12d   :  { %386 = vset.pattern.permute.xlu1 %v487_v13 }
 0x12e   :  { %110 = vperm.xlu1 %386, %v107_v25  }
 0x132   :  { %388 = vset.pattern.permute.xlu1 %v490_v18  ;;  %v79_v18 = vld [vmem:[#allocation6 + $0x38] sm:$0xff] }
 0x133   :  { %118 = vperm.xlu1 %388, %v567_v17   ;;  %81 = vst.msk [vmem:[#allocation2 + $0x38] sm:$0xff] %vm52_vm0, %v79_v18  ;;  %v63_v18 = vld [vmem:[#allocation6 + $0x18] sm:$0xff] }
 0x134   :  { %65 = vst.msk [vmem:[#allocation2 + $0x18] sm:$0xff] %vm52_vm0, %v63_v18 }
 0x136   :  { %v593_v41 = vpop.permute.xlu0 %125 }
 0x137   :  { %v128_v43 = vsub.f32 %v40_v27, %v593_v41  ;;  %vm132_vm5 = vcmp.le.f32.partialorder %v40_v27, %v593_v41  ;;  %390 = vset.pattern.permute.xlu1 %v492_v6  ;;  %v236_v27 = vsel %vm235_vm8, 1, %v486_v12  ;;  %vm138_vm15 = vcmp.lt.f32.partialorder %v583_v28, %v593_v41 }
 0x197   :  { %v164_v29 = vpop.permute.xlu1 %163 }
 0x198   :  { %v165_v30 = vsel %vm162_vm3, %v164_v29, 1.0 }
 0x199   :  { %v166_v31 = vmul.f32 %v165_v30, %v161_v22 }
 0x19b   :  { %168 = vrot.lane.b32.xlu1 %v166_v31, %s483_s3 }
 0x1a7   :  { %v179_v61 = vpop.permute.xlu0 %178 }
 0x1a8   :  { %v99_v33 = vpop.permute.xlu1 %98  ;;  %v603_v62 = vmul.f32 %v179_v61, %v91_v60 }
 0x1a9   :  { %v101_v34 = vsub.f32 %v99_v33, %v92_v32 }
 0x1ab   :  { %v590_v35 = vmul.f32 0.083333336, %v101_v34 }
 0x1ad   :  { %v104_v36 = vadd.f32 1.0, %v590_v35  ;;  %v111_v39 = vpop.permute.xlu1 %110 }
 0x1af   :  { %396 = vlog2.f32 %v104_v36 }
 0x1b2   :  { %v119_v50 = vpop.permute.xlu1 %118 }
 0x1b3   :  { %v121_v29 = vmul.f32 %v119_v50, %v590_v35 }
 0x1b9   :  { %v397_v37 = vpop.eup %396 }
 0x1ba   :  { %v106_v38 = vmul.f32 0.6931472, %v397_v37  ;;  %v93_v37 = vld [vmem:[#allocation2 + $0x38] sm:$0xff] }
 0x1bc   :  { %v113_v40 = vmul.f32 %v111_v39, %v106_v38  ;;  %v129_v44 = vmul.f32 %v128_v43, %v106_v38  ;;  %v211_v39 = vsub.f32 1.0, %v555_v7 }
 0x1be   :  { %v114_v42 = vmul.f32 1.442695, %v113_v40  ;;  %v130_v45 = vmul.f32 1.442695, %v129_v44  ;;  %v214_v44 = vsub.f32 1.0, %v93_v37 }
 0x1c0   :  { %398 = vpow2.f32 %v114_v42 }
 0x1c1   :  { %400 = vpow2.f32 %v130_v45 }
 0x1ca   :  { %v399_v46 = vpop.eup %398 }
 0x1cb   :  { %v116_v47 = vsub.f32 1.0, %v399_v46  ;;  %v401_v48 = vpop.eup %400 }
 0x1cc   :  { %v133_v49 = vsub.f32 1.0, %v401_v48  ;;  %v655_v48 = vld [vmem:[#allocation2 + $0x8] sm:$0xff] }
 0x1cd   :  { %402 = vrcp.f32 %v116_v47 }
 0x1ce   :  { %v134_v51 = vmul.f32 %v133_v49, %v119_v50 }
 0x1d7   :  { %v403_v52 = vpop.eup %402 }
 0x1d8   :  { %v135_v53 = vmul.f32 %v403_v52, %v134_v51  ;;  %v123_v30 = vmul.f32 %v403_v52, %v121_v29  ;;  %v89_v29 = vld [vmem:[#allocation2 + $0x18] sm:$0xff] }
 0x1da   :  { %v600_v57 = vsel %vm132_vm5, %v135_v53, 0.0 }
 0x1db   :  { %vm145_vm10 = vcmp.gt.f32.partialorder %v600_v57, 0.0 }
 0x20d   :  { %v169_v54 = vpop.permute.xlu1 %168 }
 0x20e   :  { %v170_v55 = vsel %vm167_vm4, %v169_v54, 1.0 }
 0x20f   :  { %v171_v56 = vmul.f32 %v170_v55, %v166_v31  ;;  %v142_v31 = vmul.f32 %v600_v57, %v590_v35 }
 0x211   :  { %v183_v58 = vmul.f32 %v171_v56, %v600_v57  ;;  %v143_v32 = vsub.f32 %v123_v30, %v142_v31  ;;  %v495_v30 = vmov 5  }
 0x213   :  { %v184_v59 = vadd.f32 1e-12, %v183_v58  ;;  %v144_v34 = vsel %vm41_vm9, %v143_v32, 0.0 }
 0x215   :  { %404 = vrcp.f32 %v184_v59 }
 0x216   :  { %406 = vrcp.f32 %v600_v57 }
 0x21f   :  { %v405_v63 = vpop.eup %404 }
 0x220   :  { %v186_v0 = vmul.f32 %v405_v63, %v603_v62  ;;  %v407_v33 = vpop.eup %406 }
 0x221   :  { %v147_v36 = vmul.f32 %v407_v33, %v144_v34 }
 0x222   :  { %187 = vrot.lane.b32.xlu1 %v186_v0, %s485_s1 }
 0x223   :  { %v148_v43 = vsel %vm145_vm10, %v147_v36, 0.0 }
 0x224   :  { %v182_v49 = vmul.f32 %v603_v62, %v148_v43  ;;  %v94_v43 = vld [vmem:[#allocation2 + $0x40] sm:$0xff] }
 0x294   :  { %v188_v1 = vpop.permute.xlu1 %187 }
 0x295   :  { %v189_v2 = vsel %vm152_vm1, %v188_v1, 0.0 }
 0x296   :  { %v190_v3 = vadd.f32 %v189_v2, %v186_v0 }
 0x298   :  { %191 = vrot.lane.b32.xlu1 %v190_v3, %s488_s6 }
 0x30a   :  { %v192_v8 = vpop.permute.xlu1 %191 }
 0x30b   :  { %v193_v9 = vsel %vm157_vm2, %v192_v8, 0.0 }
 0x30c   :  { %v194_v10 = vadd.f32 %v193_v9, %v190_v3 }
 0x30e   :  { %195 = vrot.lane.b32.xlu0 %v194_v10, %s491_s8 }
 0x380   :  { %v196_v13 = vpop.permute.xlu0 %195 }
 0x381   :  { %v197_v14 = vsel %vm162_vm3, %v196_v13, 0.0 }
 0x382   :  { %v198_v15 = vadd.f32 %v197_v14, %v194_v10 }
 0x384   :  { %199 = vrot.lane.b32.xlu1 %v198_v15, %s483_s3 }
 0x388   :  { %227 = vperm.xlu1 %390, %v225_v19   ;;  %v493_v19 = vmov 15  }
 0x38c   :  { %249 = vperm.xlu1 %390, %v247_v20  }
 0x3f6   :  { %v200_v22 = vpop.permute.xlu1 %199 }
 0x3f7   :  { %v201_v23 = vsel %vm167_vm4, %v200_v22, 0.0 }
 0x3f8   :  { %v202_v24 = vadd.f32 %v201_v23, %v198_v15  ;;  %v494_v23 = vmov 4  }
 0x3f9   :  { %393 = vset.pattern.permute.xlu1 %v494_v23 }
 0x3fa   :  { %v203_v25 = vsub.f32 1.0, %v202_v24 }
 0x3fc   :  { %v625_v26 = vmul.f32 %v203_v25, %v171_v56 }
 0x3fe   :  { %205 = vrot.lane.b32.xlu0 %v625_v26, %s485_s1 }
 0x402   :  { %238 = vperm.xlu0 %391, %v236_v27  }
 0x406   :  { %392 = vset.pattern.permute.xlu0 %v493_v19 }
 0x407   :  { %v228_v59 = vpop.permute.xlu1 %227 }
 0x408   :  { %vm229_vm11 = vcmp.eq.s32.totalorder %v228_v59, 1 }
 0x40b   :  { %v250_v61 = vpop.permute.xlu1 %249 }
 0x40c   :  { %vm251_vm13 = vcmp.eq.s32.totalorder %v250_v61, 1 }
 0x470   :  { %v206_v12 = vpop.permute.xlu0 %205 }
 0x471   :  { %v641_v38 = vsel %vm152_vm1, %v206_v12, 1.0 }
 0x472   :  { %v646_v40 = vmul.f32 %v641_v38, %v600_v57  ;;  %v210_v42 = vmul.f32 %v641_v38, %v144_v34  ;;  %v300_v34 = vmul.f32 0.083333336, %v567_v17 }
 0x474   :  { %v212_v45 = vmul.f32 %v211_v39, %v210_v42  ;;  %v216_v46 = vmul.f32 %v210_v42, %v555_v7  ;;  %v222_v47 = vmul.f32 %v646_v40, %v555_v7  ;;  %342 = vst [vmem:[#allocation8 + $0x50] sm:$0xff] %v646_v40 }
 0x476   :  { %v213_v50 = vmul.f32 %v212_v45, %v655_v48  ;;  %v223_v51 = vadd.f32 %v222_v47, %v603_v62  ;;  %v217_v53 = vadd.f32 %v216_v46, %v182_v49 }
 0x478   :  { %v215_v52 = vmul.f32 %v214_v44, %v213_v50  ;;  %332 = vst [vmem:[#allocation8 + $0x28] sm:$0xff] %v223_v51  ;;  %243 = vrot.lane.b32.xlu0 %v223_v51, %s488_s6  ;;  %232 = vrot.lane.b32.xlu1 %v223_v51, %s485_s1  ;;  %v230_v3 = vsel %vm229_vm11, %v223_v51, 0.0  ;;  %v309_v44 = vmul.f32 %v211_v39, %v655_v48 }
 0x47a   :  { %v218_v54 = vsub.f32 %v210_v42, %v215_v52  ;;  %v320_v55 = vadd.f32 %v217_v53, %v215_v52 }
 0x47c   :  { %v662_v56 = vsub.f32 %v218_v54, %v217_v53  ;;  %v321_v58 = vadd.f32 %v320_v55, %v223_v51 }
 0x47e   :  { %326 = vst [vmem:[#allocation8 + $0x10] sm:$0xff] %v662_v56  ;;  %348 = vst [vmem:[#allocation8 + $0x68] sm:$0xff] %v321_v58 }
 0x481   :  { %v239_v60 = vpop.permute.xlu0 %238 }
 0x482   :  { %vm240_vm12 = vcmp.eq.s32.totalorder %v239_v60, 1 }
 0x4ea   :  { %v244_v63 = vpop.permute.xlu0 %243  ;;  %v233_v0 = vpop.permute.xlu1 %232 }
 0x4eb   :  { %v245_v1 = vsel %vm157_vm2, %v244_v63, 0.0  ;;  %v234_v2 = vsel %vm152_vm1, %v233_v0, 0.0 }
 0x4ec   :  { %v241_v6 = vsel %vm240_vm12, %v234_v2, 0.0  ;;  %v252_v9 = vsel %vm251_vm13, %v245_v1, 0.0 }
 0x4ed   :  { %v242_v8 = vadd.f32 %v241_v6, %v230_v3 }
 0x4ef   :  { %v253_v10 = vadd.f32 %v252_v9, %v242_v8 }
 0x4f1   :  { %334 = vst [vmem:[#allocation8 + $0x30] sm:$0xff] %v253_v10  ;;  %v272_v13 = vsub.f32 %v223_v51, %v253_v10 }
 0x4f3   :  { %273 = vrot.lane.b32.xlu1 %v272_v13, %s485_s1 }
 0x565   :  { %v274_v14 = vpop.permute.xlu1 %273 }
 0x566   :  { %v275_v15 = vsel %vm152_vm1, %v274_v14, 0.0 }
 0x567   :  { %v276_v16 = vadd.f32 %v275_v15, %v272_v13 }
 0x569   :  { %277 = vrot.lane.b32.xlu0 %v276_v16, %s488_s6 }
 0x5db   :  { %v278_v20 = vpop.permute.xlu0 %277 }
 0x5dc   :  { %v279_v21 = vsel %vm157_vm2, %v278_v20, 0.0 }
 0x5dd   :  { %v280_v22 = vadd.f32 %v279_v21, %v276_v16 }
 0x5df   :  { %281 = vrot.lane.b32.xlu1 %v280_v22, %s491_s8 }
 0x651   :  { %v282_v24 = vpop.permute.xlu1 %281 }
 0x652   :  { %v283_v25 = vsel %vm162_vm3, %v282_v24, 0.0 }
 0x653   :  { %v284_v27 = vadd.f32 %v283_v25, %v280_v22 }
 0x655   :  { %285 = vrot.lane.b32.xlu0 %v284_v27, %s483_s3 }
 0x659   :  { %256 = vperm.xlu0 %392, %v89_v29  }
 0x65d   :  { %395 = vset.pattern.permute.xlu0 %v495_v30 }
 0x6c7   :  { %v286_v31 = vpop.permute.xlu0 %285 }
 0x6c8   :  { %v287_v32 = vsel %vm167_vm4, %v286_v31, 0.0 }
 0x6c9   :  { %v288_v33 = vadd.f32 %v287_v32, %v284_v27 }
 0x6cb   :  { %290 = vrot.lane.b32.xlu1 %v288_v33, %s496_s9 }
 0x6cf   :  { %139 = vrot.lane.b32.xlu1 %v600_v57, %s489_s7  ;;  %v310_v57 = vsub.f32 1.0, %v94_v43 }
 0x6d1   :  { %v311_v47 = vmul.f32 %v310_v57, %v309_v44 }
 0x6d3   :  { %267 = vperm.xlu1 %393, %v567_v17   ;;  %v312_v39 = vsub.f32 1.0, %v311_v47 }
 0x6d5   :  { %v313_v28 = vsub.f32 %v312_v39, %v555_v7 }
 0x6d7   :  { %394 = vset.pattern.permute.xlu1 %v495_v30 }
 0x6d8   :  { %v257_v36 = vpop.permute.xlu0 %256  ;;  %305 = vperm.xlu1 %394, %v300_v34  }
 0x6d9   :  { %v259_v12 = vsel %vm41_vm9, %v89_v29, %v257_v36 }
 0x6da   :  { %v260_v37 = vsub.f32 1.0, %v259_v12 }
 0x6dc   :  { %v261_v42 = vmul.f32 %v260_v37, %v253_v10 }
 0x6de   :  { %336 = vst [vmem:[#allocation8 + $0x38] sm:$0xff] %v261_v42 }
 0x73d   :  { %v291_v45 = vpop.permute.xlu1 %290 }
 0x73e   :  { %v292_v46 = vsel %vm289_vm14, %v291_v45, 0.0 }
 0x73f   :  { %v293_v17 = vadd.f32 %v292_v46, %v288_v33 }
 0x741   :  { %v294_v49 = vmax.f32 %v293_v17, 0.0  ;;  %v140_v50 = vpop.permute.xlu1 %139 }
 0x742   :  { %v141_v51 = vsel %vm138_vm15, %v140_v50, 0.0 }
 0x743   :  { %v209_v52 = vmul.f32 %v625_v26, %v141_v51  ;;  %v220_v53 = vmul.f32 %v641_v38, %v141_v51  ;;  %295 = vrot.lane.b32.xlu0 %v294_v49, %s485_s1  ;;  %v314_v26 = vmul.f32 %v313_v28, %v646_v40 }
 0x745   :  { %v221_v48 = vmul.f32 %v220_v53, %v550_v4  ;;  %v262_v54 = vmul.f32 %v220_v53, %v552_v5  ;;  %v299_v55 = vadd.f32 %v294_v49, %v209_v52  ;;  %344 = vst [vmem:[#allocation8 + $0x58] sm:$0xff] %v209_v52  ;;  %v315_v38 = vsub.f32 %v314_v26, %v603_v62 }
 0x747   :  { %v263_v58 = vadd.f32 %v221_v48, %v662_v56  ;;  %328 = vst [vmem:[#allocation8 + $0x18] sm:$0xff] %v221_v48  ;;  %330 = vst [vmem:[#allocation8 + $0x20] sm:$0xff] %v262_v54  ;;  %v265_v59 = vmul.f32 %v221_v48, %v590_v35  ;;  %v316_v4 = vmul.f32 %v315_v38, %v590_v35 }
 0x748   :  { %v271_v61 = vmul.f32 %v262_v54, %v590_v35 }
 0x749   :  { %v264_v41 = vadd.f32 %v263_v58, %v261_v42 }
 0x74b   :  { %324 = vst [vmem:[#allocation8 + $0x8] sm:$0xff] %v264_v41 }
 0x752   :  { %v268_v60 = vpop.permute.xlu1 %267 }
 0x753   :  { %v270_v5 = vmul.f32 %v268_v60, %v265_v59 }
 0x755   :  { %v317_v63 = vsub.f32 %v316_v4, %v270_v5 }
 0x757   :  { %v318_v56 = vsub.f32 %v317_v63, %v271_v61  ;;  %v306_v3 = vpop.permute.xlu1 %305 }
 0x759   :  { %v319_v0 = vadd.f32 %v318_v56, %v264_v41  ;;  %338 = vst [vmem:[#allocation8 + $0x40] sm:$0xff] %v318_v56 }
 0x75b   :  { %346 = vst [vmem:[#allocation8 + $0x60] sm:$0xff] %v319_v0 }
 0x7b5   :  { %v296_v7 = vpop.permute.xlu0 %295 }
 0x7b6   :  { %v297_v1 = vsel %vm152_vm1, %v296_v7, 0.0 }
 0x7b7   :  { %v298_v2 = vadd.f32 %v297_v1, %v646_v40 }
 0x7b9   :  { %v301_v62 = vadd.f32 %v299_v55, %v298_v2 }
 0x7bb   :  { %v302_v6 = vmul.f32 0.5, %v301_v62 }
 0x7bd   :  { %v308_v8 = vmul.f32 %v306_v3, %v302_v6 }
 0x7bf   :  { %340 = vst [vmem:[#allocation8 + $0x48] sm:$0xff] %v308_v8 }
 0x7c0   :  { %463 = shalt.err (!%p460_p6)
}
 0x7c1   :  { %s464_s15 = scalar_lea.hbm %s726_s2, 1792 }
 0x7c2   :  { %p465_p7 = scmp.ne.s32.totalorder %s726_s2, %s464_s15  ;;  %p468_p8 = scmp.lt.u32.totalorder %s464_s15, %s726_s2 }
 0x7c4   :  { %p470_p9 = pnand %p468_p8, %p465_p7 }
 0x7c6   :  { %473 = shalt.err (!%p470_p9)
}
 0x7c7   :  { %360 = dma.vmem_to_hbm [thread:$0]  %s355_s11, 1792, %s726_s2, [#allocation5], %s482_s0, %s482_s0, %s483_s3  }
 0x7c8   :  { %478 = dma.done.wait [#allocation5], 1792  }
 0x7c9   :  { %479 = vsyncadd [#allocation5], 4294965504 }
 0x7ca   :  { %364 = vsyncpa [#allocation4], 1 }
 0x7cb   :  { %365 = vsyncpa [#allocation7], 1 }
 0x7cc   :  { %366 = vsyncpa [#allocation5], 1 }

</bundles_post_ra>
